<compile_context>
chip_gen: v7x
topology: tpu7x:2x2x1
jax: 0.10.0
libtpu: 0.0.40
codegen_flags: <defaults>
</compile_context>

<pallas_src>
import jax
import jax.numpy as jnp
from jax import lax
from jax.experimental import pallas as pl
from jax.experimental.pallas import tpu as pltpu


ONE_HOT_MAX_ROWS = 2048   # above this the one-hot MXU gather costs more than it saves


def _round_up(x, m):
    return ((x + m - 1) // m) * m


def _vmem_limit_bytes(need_bytes):
    """2x the estimated need, capped below physical VMEM minus ~8 MiB headroom."""
    try:
        cap = int(pltpu.get_tpu_info().vmem_capacity_bytes)   # 64 MiB v7x, 128 MiB v5e/v6e
    except Exception:
        cap = 64 << 20                                        # conservative (v7x-sized)
    cap = max(cap - (8 << 20), 16 << 20)                      # headroom for Mosaic scratch
    return int(min(max(2 * need_bytes, 8 << 20), cap))


def _split_bf16_planes(t):
    """Dekker-style split of an f32 array into 3 stacked bf16 planes (hi, mid, lo).

    A {0,1} one-hot is exact in bf16, so three single-pass bf16 MXU matmuls
    against these planes reconstruct the f32 table values to ~2^-24 relative.
    """
    hi = t.astype(jnp.bfloat16)
    r1 = t - hi.astype(jnp.float32)
    mid = r1.astype(jnp.bfloat16)
    lo = (r1 - mid.astype(jnp.float32)).astype(jnp.bfloat16)
    return jnp.stack([hi, mid, lo], axis=0)                   # (3, *t.shape) bf16


def prepare_mfm_tables(user_table, place_table):
    """One-time layout prep (hoisted out of the forward, review item #9)."""
    user_table = jnp.asarray(user_table, jnp.float32)
    place_table = jnp.asarray(place_table, jnp.float32)
    NU, D = user_table.shape
    NP, _ = place_table.shape

    prep = {
        "num_users": NU, "num_places": NP, "dim": D,
        # Row-major (N, 1, D) views for the indexed-gather path (exact, no MXU,
        # no padding needed -- last two block dims equal the full array dims).
        "u_rows": user_table.reshape(NU, 1, D),
        "p_rows": place_table.reshape(NP, 1, D),
        "one_hot_ok": max(NU, NP) <= ONE_HOT_MAX_ROWS,
    }

    if prep["one_hot_ok"]:
        d_pad = _round_up(D, 8)        # vector_dim on sublanes after transpose
        nu_pad = _round_up(NU, 128)    # contraction dim on lanes
        np_pad = _round_up(NP, 128)
        # Zero-pad + transpose so vector_dim is on sublanes and the row index
        # (matmul contraction dim) is on lanes; zero padding keeps math exact.
        ut = jnp.zeros((d_pad, nu_pad), jnp.float32).at[:D, :NU].set(user_table.T)
        pt = jnp.zeros((d_pad, np_pad), jnp.float32).at[:D, :NP].set(place_table.T)
        prep["ut_planes"] = _split_bf16_planes(ut)             # (3, d_pad, nu_pad) bf16
        prep["pt_planes"] = _split_bf16_planes(pt)             # (3, d_pad, np_pad) bf16
        prep["d_pad"], prep["nu_pad"], prep["np_pad"] = d_pad, nu_pad, np_pad
    return prep


# --------------------------------------------------------------------------- #
# Path A: small tables -> VMEM-resident one-hot MXU gather, batch-tiled grid.  #
# --------------------------------------------------------------------------- #
def mfm_onehot_kernel(u_idx_ref, p_idx_ref, ut_ref, pt_ref, out_ref):
    """One batch tile of TB (user, place) dot products.

    u_idx_ref / p_idx_ref : (1, TB)            int32  -- indices for this tile
    ut_ref                : (3, D_pad, NU_pad) bf16   -- user table hi/mid/lo planes
    pt_ref                : (3, D_pad, NP_pad) bf16   -- place table hi/mid/lo planes
    out_ref               : (1, TB)            f32    -- lane-dense output slab
    """
    u_ids = u_idx_ref[...]                                     # (1, TB)
    p_ids = p_idx_ref[...]                                     # (1, TB)
    d_pad, nu = ut_ref.shape[1], ut_ref.shape[2]
    np_ = pt_ref.shape[2]
    tb = u_ids.shape[1]

    # One-hot gather operands (exact in bf16), batch tile on lanes.
    u_oh = (lax.broadcasted_iota(jnp.int32, (nu, tb), 0) == u_ids).astype(jnp.bfloat16)
    p_oh = (lax.broadcasted_iota(jnp.int32, (np_, tb), 0) == p_ids).astype(jnp.bfloat16)

    # Three single-pass bf16 MXU matmuls per table (hi + mid + lo) reconstruct
    # the f32 rows essentially exactly; f32 accumulation via preferred dtype.
    u_cols = jnp.zeros((d_pad, tb), jnp.float32)
    p_cols = jnp.zeros((d_pad, tb), jnp.float32)
    for k in range(3):                                         # static, unrolled
        u_cols = u_cols + jnp.dot(ut_ref[k], u_oh, preferred_element_type=jnp.float32)
        p_cols = p_cols + jnp.dot(pt_ref[k], p_oh, preferred_element_type=jnp.float32)

    # Fused elementwise product + sublane reduction -> (1, TB), lane-dense.
    out_ref[...] = jnp.sum(u_cols * p_cols, axis=0, keepdims=True)


def _mfm_forward_onehot(users, places, prep, *, max_tile, single_buffer_tables):
    B = users.shape[0]
    d_pad, nu_pad, np_pad = prep["d_pad"], prep["nu_pad"], prep["np_pad"]

    # Batch tile: lane multiple, divides b_pad, and >= 2 tiles whenever the
    # padded batch allows it so megacore can split the grid (review item #6).
    b_pad = _round_up(max(B, 1), 128)
    tb = min(max_tile, b_pad)
    if b_pad >= 256:
        tb = min(tb, b_pad // 2)
    tb = max(128, (tb // 128) * 128)
    while b_pad % tb:
        tb -= 128
    num_tiles = b_pad // tb

    # Indices padded with 0 (a valid row; padded lanes are sliced off below).
    u_idx = jnp.zeros((1, b_pad), jnp.int32).at[0, :B].set(users.astype(jnp.int32))
    p_idx = jnp.zeros((1, b_pad), jnp.int32).at[0, :B].set(places.astype(jnp.int32))

    # VMEM budget (review item #8): resident bf16 planes + one-hot temps +
    # gathered f32 columns + double-buffered index/output tiles.
    table_bufs = 1 if single_buffer_tables else 2
    bytes_tables = table_bufs * 3 * (d_pad * nu_pad + d_pad * np_pad) * 2   # bf16 planes
    bytes_onehot = (nu_pad + np_pad) * tb * 2                               # bf16 one-hots
    bytes_cols = 4 * d_pad * tb * 4                                         # f32 cols + temps
    bytes_io = 2 * (2 * tb * 4) + 2 * tb * 4                                # idx + out tiles
    vmem_limit = _vmem_limit_bytes(bytes_tables + bytes_onehot + bytes_cols + bytes_io)

    # Tables: full-array block, constant index_map -> fetched once and
    # VMEM-resident; single-buffered so they are not held twice (review #3).
    table_kwargs = dict(pipeline_mode=pl.Buffered(1)) if single_buffer_tables else {}
    in_specs = [
        pl.BlockSpec((1, tb), lambda i: (0, i)),                       # users tile
        pl.BlockSpec((1, tb), lambda i: (0, i)),                       # places tile
        pl.BlockSpec((3, d_pad, nu_pad), lambda i: (0, 0, 0), **table_kwargs),
        pl.BlockSpec((3, d_pad, np_pad), lambda i: (0, 0, 0), **table_kwargs),
    ]

    out = pl.pallas_call(
        mfm_onehot_kernel,
        out_shape=jax.ShapeDtypeStruct((1, b_pad), jnp.float32),
        grid_spec=pltpu.PrefetchScalarGridSpec(
            num_scalar_prefetch=0,
            grid=(num_tiles,),
            in_specs=in_specs,
            out_specs=pl.BlockSpec((1, tb), lambda i: (0, i)),         # lane-dense output
        ),
        compiler_params=pltpu.CompilerParams(
            # Tiles are independent -> megacore sharding on v7x.
            # TODO(synk): verify both TCs are used in xprof; else switch to
            # pltpu.CORE_PARALLEL / pl.core_map.
            dimension_semantics=("parallel",),
            vmem_limit_bytes=vmem_limit),
    )(u_idx, p_idx, prep["ut_planes"], prep["pt_planes"])
    return out[0, :B]


# --------------------------------------------------------------------------- #
# Path B: any table size -> scalar-prefetch data-dependent row gather.         #
# --------------------------------------------------------------------------- #
def mfm_gather_kernel(u_ids_ref, p_ids_ref, u_row_ref, p_row_ref, out_ref):
    """One (user, place) pair per grid step; rows gathered straight from HBM.

    u_row_ref / p_row_ref : (1, 1, D) f32   -- the gathered embedding rows
    out_ref               : (1, 1, 1) f32
    """
    out_ref[...] = jnp.sum(u_row_ref[...] * p_row_ref[...], axis=-1, keepdims=True)


def _mfm_forward_gather(users, places, prep):
    B = users.shape[0]
    D = prep["dim"]
    u_ids = users.astype(jnp.int32)
    p_ids = places.astype(jnp.int32)

    out = pl.pallas_call(
        mfm_gather_kernel,
        out_shape=jax.ShapeDtypeStruct((B, 1, 1), jnp.float32),
        grid_spec=pltpu.PrefetchScalarGridSpec(
            num_scalar_prefetch=2,                 # users / places ids land in SMEM
            grid=(B,),
            in_specs=[
                # Row gather: block index along the (unconstrained) leading row
                # axis comes from the prefetched id arrays; last two block dims
                # equal the full array dims (1, D) so no (8,128) padding needed.
                pl.BlockSpec((1, 1, D), lambda b, u, p: (u[b], 0, 0)),
                pl.BlockSpec((1, 1, D), lambda b, u, p: (p[b], 0, 0)),
            ],
            out_specs=pl.BlockSpec((1, 1, 1), lambda b, u, p: (b, 0, 0)),
        ),
        compiler_params=pltpu.CompilerParams(dimension_semantics=("arbitrary",)),
    )(u_ids, p_ids, prep["u_rows"], prep["p_rows"])
    return out[:, 0, 0]


# --------------------------------------------------------------------------- #
# Public forward.                                                              #
# --------------------------------------------------------------------------- #
def mfm_forward(users, places, prep, *, max_tile=1024, force_path=None):
    """users, places: int [B]; prep: output of prepare_mfm_tables(). Returns f32 [B]."""
    path = force_path or ("one_hot" if prep["one_hot_ok"] else "gather")
    if path == "one_hot":
        try:
            return _mfm_forward_onehot(users, places, prep, max_tile=max_tile,
                                       single_buffer_tables=True)
        except Exception:
            # jax versions without BlockSpec(pipeline_mode=pl.Buffered(1)):
            # fall back to default double-buffered resident tables.
            return _mfm_forward_onehot(users, places, prep, max_tile=max_tile,
                                       single_buffer_tables=False)
    return _mfm_forward_gather(users, places, prep)


if __name__ == "__main__":
    # Small synthetic problem consistent with Mfm(num_users, num_places, vector_dim=50).
    num_users, num_places, vector_dim = 16, 12, 50
    batch = 8

    key = jax.random.PRNGKey(0)
    k1, k2, k3, k4 = jax.random.split(key, 4)

    # nn.Embedding default init is N(0, 1) -- deterministic synthetic params.
    user_table = jax.random.normal(k1, (num_users, vector_dim), dtype=jnp.float32)
    place_table = jax.random.normal(k2, (num_places, vector_dim), dtype=jnp.float32)

    users = jax.random.randint(k3, (batch,), 0, num_users, dtype=jnp.int32)
    places = jax.random.randint(k4, (batch,), 0, num_places, dtype=jnp.int32)

    # One-time layout prep (hoisted out of the forward).
    prep = prepare_mfm_tables(user_table, place_table)

    # Pure-JAX reference of the PyTorch forward.
    ref = jnp.sum(user_table[users] * place_table[places], axis=1)

    # Fast path: VMEM-resident tables + one-hot MXU gather (bf16 hi/mid/lo planes).
    out_fast = jax.block_until_ready(mfm_forward(users, places, prep))
    assert out_fast.shape == (batch,)
    assert jnp.allclose(out_fast, ref, atol=1e-4, rtol=1e-4), (out_fast, ref)

    # Fallback path: indexed row gather via scalar-prefetch (exact, any table size).
    out_gather = jax.block_until_ready(
        mfm_forward(users, places, prep, force_path="gather"))
    assert out_gather.shape == (batch,)
    assert jnp.allclose(out_gather, ref, atol=1e-5, rtol=1e-5), (out_gather, ref)

    print("KERNEL_OK")
</pallas_src>

<mosaic_0001>
module attributes {stable_mosaic.version = 11 : i64} {
  func.func @mfm_onehot_kernel(%arg0: i32, %arg1: memref<1x128xi32, #tpu.memory_space<vmem>>, %arg2: memref<1x128xi32, #tpu.memory_space<vmem>>, %arg3: memref<3x56x128xbf16, #tpu.memory_space<vmem>>, %arg4: memref<3x56x128xbf16, #tpu.memory_space<vmem>>, %arg5: memref<1x128xf32, #tpu.memory_space<vmem>>) attributes {dimension_semantics = [#tpu.dimension_semantics<parallel>], iteration_bounds = array<i64: 1>, scalar_prefetch = 0 : i64, scratch_operands = 0 : i64, tpu.core_type = #tpu.core_type<tc>, window_params = [{transform_indices = @transform_0, window_bounds = array<i64: 1, 128>}, {transform_indices = @transform_1, window_bounds = array<i64: 1, 128>}, {pipeline_mode = #tpu.pipeline_mode<synchronous>, transform_indices = @transform_2, window_bounds = array<i64: 3, 56, 128>}, {pipeline_mode = #tpu.pipeline_mode<synchronous>, transform_indices = @transform_3, window_bounds = array<i64: 3, 56, 128>}, {transform_indices = @transform_4, window_bounds = array<i64: 1, 128>}]} {
    %c0 = arith.constant 0 : index
    %c0_0 = arith.constant 0 : index
    %0 = vector.load %arg1[%c0, %c0_0] : memref<1x128xi32, #tpu.memory_space<vmem>>, vector<1x128xi32>
    %c0_1 = arith.constant 0 : index
    %c0_2 = arith.constant 0 : index
    %1 = vector.load %arg2[%c0_1, %c0_2] : memref<1x128xi32, #tpu.memory_space<vmem>>, vector<1x128xi32>
    %2 = tpu.iota {dimensions = array<i32: 0>} : vector<128x128xi32>
    %3 = vector.broadcast %0 : vector<1x128xi32> to vector<128x128xi32>
    %4 = arith.cmpi eq, %2, %3 : vector<128x128xi32>
    %5 = arith.extui %4 : vector<128x128xi1> to vector<128x128xi32>
    %6 = arith.sitofp %5 : vector<128x128xi32> to vector<128x128xf32>
    %7 = arith.truncf %6 : vector<128x128xf32> to vector<128x128xbf16>
    %8 = tpu.iota {dimensions = array<i32: 0>} : vector<128x128xi32>
    %9 = vector.broadcast %1 : vector<1x128xi32> to vector<128x128xi32>
    %10 = arith.cmpi eq, %8, %9 : vector<128x128xi32>
    %11 = arith.extui %10 : vector<128x128xi1> to vector<128x128xi32>
    %12 = arith.sitofp %11 : vector<128x128xi32> to vector<128x128xf32>
    %13 = arith.truncf %12 : vector<128x128xf32> to vector<128x128xbf16>
    %cst = arith.constant 0.000000e+00 : f32
    %14 = vector.broadcast %cst : f32 to vector<56x128xf32>
    %cst_3 = arith.constant 0.000000e+00 : f32
    %15 = vector.broadcast %cst_3 : f32 to vector<56x128xf32>
    %c0_4 = arith.constant 0 : index
    %c0_5 = arith.constant 0 : index
    %c0_6 = arith.constant 0 : index
    %16 = vector.load %arg3[%c0_4, %c0_5, %c0_6] : memref<3x56x128xbf16, #tpu.memory_space<vmem>>, vector<1x56x128xbf16>
    %17 = vector.shape_cast %16 : vector<1x56x128xbf16> to vector<56x128xbf16>
    %cst_7 = arith.constant dense<0.000000e+00> : vector<56x128xf32>
    %18 = tpu.matmul %17, %7, %cst_7 {dimension_numbers = #tpu.dot_dimension_numbers<[1], [0], [0], [1], [0, 0, 1, 1], [], []>} : vector<56x128xbf16>, vector<128x128xbf16>, vector<56x128xf32> -> vector<56x128xf32>
    %19 = arith.addf %14, %18 : vector<56x128xf32>
    %c0_8 = arith.constant 0 : index
    %c0_9 = arith.constant 0 : index
    %c0_10 = arith.constant 0 : index
    %20 = vector.load %arg4[%c0_8, %c0_9, %c0_10] : memref<3x56x128xbf16, #tpu.memory_space<vmem>>, vector<1x56x128xbf16>
    %21 = vector.shape_cast %20 : vector<1x56x128xbf16> to vector<56x128xbf16>
    %cst_11 = arith.constant dense<0.000000e+00> : vector<56x128xf32>
    %22 = tpu.matmul %21, %13, %cst_11 {dimension_numbers = #tpu.dot_dimension_numbers<[1], [0], [0], [1], [0, 0, 1, 1], [], []>} : vector<56x128xbf16>, vector<128x128xbf16>, vector<56x128xf32> -> vector<56x128xf32>
    %23 = arith.addf %15, %22 : vector<56x128xf32>
    %c1 = arith.constant 1 : index
    %c0_12 = arith.constant 0 : index
    %c0_13 = arith.constant 0 : index
    %24 = vector.load %arg3[%c1, %c0_12, %c0_13] : memref<3x56x128xbf16, #tpu.memory_space<vmem>>, vector<1x56x128xbf16>
    %25 = vector.shape_cast %24 : vector<1x56x128xbf16> to vector<56x128xbf16>
    %cst_14 = arith.constant dense<0.000000e+00> : vector<56x128xf32>
    %26 = tpu.matmul %25, %7, %cst_14 {dimension_numbers = #tpu.dot_dimension_numbers<[1], [0], [0], [1], [0, 0, 1, 1], [], []>} : vector<56x128xbf16>, vector<128x128xbf16>, vector<56x128xf32> -> vector<56x128xf32>
    %27 = arith.addf %19, %26 : vector<56x128xf32>
    %c1_15 = arith.constant 1 : index
    %c0_16 = arith.constant 0 : index
    %c0_17 = arith.constant 0 : index
    %28 = vector.load %arg4[%c1_15, %c0_16, %c0_17] : memref<3x56x128xbf16, #tpu.memory_space<vmem>>, vector<1x56x128xbf16>
    %29 = vector.shape_cast %28 : vector<1x56x128xbf16> to vector<56x128xbf16>
    %cst_18 = arith.constant dense<0.000000e+00> : vector<56x128xf32>
    %30 = tpu.matmul %29, %13, %cst_18 {dimension_numbers = #tpu.dot_dimension_numbers<[1], [0], [0], [1], [0, 0, 1, 1], [], []>} : vector<56x128xbf16>, vector<128x128xbf16>, vector<56x128xf32> -> vector<56x128xf32>
    %31 = arith.addf %23, %30 : vector<56x128xf32>
    %c2 = arith.constant 2 : index
    %c0_19 = arith.constant 0 : index
    %c0_20 = arith.constant 0 : index
    %32 = vector.load %arg3[%c2, %c0_19, %c0_20] : memref<3x56x128xbf16, #tpu.memory_space<vmem>>, vector<1x56x128xbf16>
    %33 = vector.shape_cast %32 : vector<1x56x128xbf16> to vector<56x128xbf16>
    %cst_21 = arith.constant dense<0.000000e+00> : vector<56x128xf32>
    %34 = tpu.matmul %33, %7, %cst_21 {dimension_numbers = #tpu.dot_dimension_numbers<[1], [0], [0], [1], [0, 0, 1, 1], [], []>} : vector<56x128xbf16>, vector<128x128xbf16>, vector<56x128xf32> -> vector<56x128xf32>
    %35 = arith.addf %27, %34 : vector<56x128xf32>
    %c2_22 = arith.constant 2 : index
    %c0_23 = arith.constant 0 : index
    %c0_24 = arith.constant 0 : index
    %36 = vector.load %arg4[%c2_22, %c0_23, %c0_24] : memref<3x56x128xbf16, #tpu.memory_space<vmem>>, vector<1x56x128xbf16>
    %37 = vector.shape_cast %36 : vector<1x56x128xbf16> to vector<56x128xbf16>
    %cst_25 = arith.constant dense<0.000000e+00> : vector<56x128xf32>
    %38 = tpu.matmul %37, %13, %cst_25 {dimension_numbers = #tpu.dot_dimension_numbers<[1], [0], [0], [1], [0, 0, 1, 1], [], []>} : vector<56x128xbf16>, vector<128x128xbf16>, vector<56x128xf32> -> vector<56x128xf32>
    %39 = arith.addf %31, %38 : vector<56x128xf32>
    %40 = arith.mulf %35, %39 : vector<56x128xf32>
    %cst_26 = arith.constant dense<0.000000e+00> : vector<128xf32>
    %41 = vector.multi_reduction <add>, %40, %cst_26 [0] : vector<56x128xf32> to vector<128xf32>
    %42 = vector.shape_cast %41 : vector<128xf32> to vector<1x128xf32>
    %c0_27 = arith.constant 0 : index
    %c0_28 = arith.constant 0 : index
    %43 = vector.load %arg5[%c0_27, %c0_28] : memref<1x128xf32, #tpu.memory_space<vmem>>, vector<1x128xf32>
    tpu.vector_store %arg5[%c0_27, %c0_28], %42 {strides = array<i32>} : memref<1x128xf32, #tpu.memory_space<vmem>>, vector<1x128xf32>,
    return
  }
  func.func @transform_0(%arg0: i32) -> (i32, i32) {
    %c0_i32 = arith.constant 0 : i32
    %c0_i32_0 = arith.constant 0 : i32
    return %c0_i32, %arg0 : i32, i32
  }
  func.func @transform_1(%arg0: i32) -> (i32, i32) {
    %c0_i32 = arith.constant 0 : i32
    %c0_i32_0 = arith.constant 0 : i32
    return %c0_i32, %arg0 : i32, i32
  }
  func.func @transform_2(%arg0: i32) -> (i32, i32, i32) {
    %c0_i32 = arith.constant 0 : i32
    %c0_i32_0 = arith.constant 0 : i32
    %c0_i32_1 = arith.constant 0 : i32
    %c0_i32_2 = arith.constant 0 : i32
    return %c0_i32, %c0_i32_0, %c0_i32_1 : i32, i32, i32
  }
  func.func @transform_3(%arg0: i32) -> (i32, i32, i32) {
    %c0_i32 = arith.constant 0 : i32
    %c0_i32_0 = arith.constant 0 : i32
    %c0_i32_1 = arith.constant 0 : i32
    %c0_i32_2 = arith.constant 0 : i32
    return %c0_i32, %c0_i32_0, %c0_i32_1 : i32, i32, i32
  }
  func.func @transform_4(%arg0: i32) -> (i32, i32) {
    %c0_i32 = arith.constant 0 : i32
    %c0_i32_0 = arith.constant 0 : i32
    return %c0_i32, %arg0 : i32, i32
  }
}

module attributes {stable_mosaic.version = 11 : i64} {
  func.func @mfm_onehot_kernel(%arg0: i32, %arg1: memref<1x128xi32, #tpu.memory_space<vmem>>, %arg2: memref<1x128xi32, #tpu.memory_space<vmem>>, %arg3: memref<3x56x128xbf16, #tpu.memory_space<vmem>>, %arg4: memref<3x56x128xbf16, #tpu.memory_space<vmem>>, %arg5: memref<1x128xf32, #tpu.memory_space<vmem>>) attributes {dimension_semantics = [#tpu.dimension_semantics<parallel>], iteration_bounds = array<i64: 1>, scalar_prefetch = 0 : i64, scratch_operands = 0 : i64, tpu.core_type = #tpu.core_type<tc>, window_params = [{transform_indices = @transform_0, window_bounds = array<i64: 1, 128>}, {transform_indices = @transform_1, window_bounds = array<i64: 1, 128>}, {pipeline_mode = #tpu.pipeline_mode<synchronous>, transform_indices = @transform_2, window_bounds = array<i64: 3, 56, 128>}, {pipeline_mode = #tpu.pipeline_mode<synchronous>, transform_indices = @transform_3, window_bounds = array<i64: 3, 56, 128>}, {transform_indices = @transform_4, window_bounds = array<i64: 1, 128>}]} {
    %c0 = arith.constant 0 : index
    %c0_0 = arith.constant 0 : index
    %0 = vector.load %arg1[%c0, %c0_0] : memref<1x128xi32, #tpu.memory_space<vmem>>, vector<1x128xi32>
    %c0_1 = arith.constant 0 : index
    %c0_2 = arith.constant 0 : index
    %1 = vector.load %arg2[%c0_1, %c0_2] : memref<1x128xi32, #tpu.memory_space<vmem>>, vector<1x128xi32>
    %2 = tpu.iota {dimensions = array<i32: 0>} : vector<128x128xi32>
    %3 = vector.broadcast %0 : vector<1x128xi32> to vector<128x128xi32>
    %4 = arith.cmpi eq, %2, %3 : vector<128x128xi32>
    %5 = arith.extui %4 : vector<128x128xi1> to vector<128x128xi32>
    %6 = arith.sitofp %5 : vector<128x128xi32> to vector<128x128xf32>
    %7 = arith.truncf %6 : vector<128x128xf32> to vector<128x128xbf16>
    %8 = tpu.iota {dimensions = array<i32: 0>} : vector<128x128xi32>
    %9 = vector.broadcast %1 : vector<1x128xi32> to vector<128x128xi32>
    %10 = arith.cmpi eq, %8, %9 : vector<128x128xi32>
    %11 = arith.extui %10 : vector<128x128xi1> to vector<128x128xi32>
    %12 = arith.sitofp %11 : vector<128x128xi32> to vector<128x128xf32>
    %13 = arith.truncf %12 : vector<128x128xf32> to vector<128x128xbf16>
    %cst = arith.constant 0.000000e+00 : f32
    %14 = vector.broadcast %cst : f32 to vector<56x128xf32>
    %cst_3 = arith.constant 0.000000e+00 : f32
    %15 = vector.broadcast %cst_3 : f32 to vector<56x128xf32>
    %c0_4 = arith.constant 0 : index
    %c0_5 = arith.constant 0 : index
    %c0_6 = arith.constant 0 : index
    %16 = vector.load %arg3[%c0_4, %c0_5, %c0_6] : memref<3x56x128xbf16, #tpu.memory_space<vmem>>, vector<1x56x128xbf16>
    %17 = vector.shape_cast %16 : vector<1x56x128xbf16> to vector<56x128xbf16>
    %cst_7 = arith.constant dense<0.000000e+00> : vector<56x128xf32>
    %18 = tpu.matmul %17, %7, %cst_7 {dimension_numbers = #tpu.dot_dimension_numbers<[1], [0], [0], [1], [0, 0, 1, 1], [], []>} : vector<56x128xbf16>, vector<128x128xbf16>, vector<56x128xf32> -> vector<56x128xf32>
    %19 = arith.addf %14, %18 : vector<56x128xf32>
    %c0_8 = arith.constant 0 : index
    %c0_9 = arith.constant 0 : index
    %c0_10 = arith.constant 0 : index
    %20 = vector.load %arg4[%c0_8, %c0_9, %c0_10] : memref<3x56x128xbf16, #tpu.memory_space<vmem>>, vector<1x56x128xbf16>
    %21 = vector.shape_cast %20 : vector<1x56x128xbf16> to vector<56x128xbf16>
    %cst_11 = arith.constant dense<0.000000e+00> : vector<56x128xf32>
    %22 = tpu.matmul %21, %13, %cst_11 {dimension_numbers = #tpu.dot_dimension_numbers<[1], [0], [0], [1], [0, 0, 1, 1], [], []>} : vector<56x128xbf16>, vector<128x128xbf16>, vector<56x128xf32> -> vector<56x128xf32>
    %23 = arith.addf %15, %22 : vector<56x128xf32>
    %c1 = arith.constant 1 : index
    %c0_12 = arith.constant 0 : index
    %c0_13 = arith.constant 0 : index
    %24 = vector.load %arg3[%c1, %c0_12, %c0_13] : memref<3x56x128xbf16, #tpu.memory_space<vmem>>, vector<1x56x128xbf16>
    %25 = vector.shape_cast %24 : vector<1x56x128xbf16> to vector<56x128xbf16>
    %cst_14 = arith.constant dense<0.000000e+00> : vector<56x128xf32>
    %26 = tpu.matmul %25, %7, %cst_14 {dimension_numbers = #tpu.dot_dimension_numbers<[1], [0], [0], [1], [0, 0, 1, 1], [], []>} : vector<56x128xbf16>, vector<128x128xbf16>, vector<56x128xf32> -> vector<56x128xf32>
    %27 = arith.addf %19, %26 : vector<56x128xf32>
    %c1_15 = arith.constant 1 : index
    %c0_16 = arith.constant 0 : index
    %c0_17 = arith.constant 0 : index
    %28 = vector.load %arg4[%c1_15, %c0_16, %c0_17] : memref<3x56x128xbf16, #tpu.memory_space<vmem>>, vector<1x56x128xbf16>
    %29 = vector.shape_cast %28 : vector<1x56x128xbf16> to vector<56x128xbf16>
    %cst_18 = arith.constant dense<0.000000e+00> : vector<56x128xf32>
    %30 = tpu.matmul %29, %13, %cst_18 {dimension_numbers = #tpu.dot_dimension_numbers<[1], [0], [0], [1], [0, 0, 1, 1], [], []>} : vector<56x128xbf16>, vector<128x128xbf16>, vector<56x128xf32> -> vector<56x128xf32>
    %31 = arith.addf %23, %30 : vector<56x128xf32>
    %c2 = arith.constant 2 : index
    %c0_19 = arith.constant 0 : index
    %c0_20 = arith.constant 0 : index
    %32 = vector.load %arg3[%c2, %c0_19, %c0_20] : memref<3x56x128xbf16, #tpu.memory_space<vmem>>, vector<1x56x128xbf16>
    %33 = vector.shape_cast %32 : vector<1x56x128xbf16> to vector<56x128xbf16>
    %cst_21 = arith.constant dense<0.000000e+00> : vector<56x128xf32>
    %34 = tpu.matmul %33, %7, %cst_21 {dimension_numbers = #tpu.dot_dimension_numbers<[1], [0], [0], [1], [0, 0, 1, 1], [], []>} : vector<56x128xbf16>, vector<128x128xbf16>, vector<56x128xf32> -> vector<56x128xf32>
    %35 = arith.addf %27, %34 : vector<56x128xf32>
    %c2_22 = arith.constant 2 : index
    %c0_23 = arith.constant 0 : index
    %c0_24 = arith.constant 0 : index
    %36 = vector.load %arg4[%c2_22, %c0_23, %c0_24] : memref<3x56x128xbf16, #tpu.memory_space<vmem>>, vector<1x56x128xbf16>
    %37 = vector.shape_cast %36 : vector<1x56x128xbf16> to vector<56x128xbf16>
    %cst_25 = arith.constant dense<0.000000e+00> : vector<56x128xf32>
    %38 = tpu.matmul %37, %13, %cst_25 {dimension_numbers = #tpu.dot_dimension_numbers<[1], [0], [0], [1], [0, 0, 1, 1], [], []>} : vector<56x128xbf16>, vector<128x128xbf16>, vector<56x128xf32> -> vector<56x128xf32>
    %39 = arith.addf %31, %38 : vector<56x128xf32>
    %40 = arith.mulf %35, %39 : vector<56x128xf32>
    %cst_26 = arith.constant dense<0.000000e+00> : vector<128xf32>
    %41 = vector.multi_reduction <add>, %40, %cst_26 [0] : vector<56x128xf32> to vector<128xf32>
    %42 = vector.shape_cast %41 : vector<128xf32> to vector<1x128xf32>
    %c0_27 = arith.constant 0 : index
    %c0_28 = arith.constant 0 : index
    %43 = vector.load %arg5[%c0_27, %c0_28] : memref<1x128xf32, #tpu.memory_space<vmem>>, vector<1x128xf32>
    tpu.vector_store %arg5[%c0_27, %c0_28], %42 {strides = array<i32>} : memref<1x128xf32, #tpu.memory_space<vmem>>, vector<1x128xf32>,
    return
  }
  func.func @transform_0(%arg0: i32) -> (i32, i32) {
    %c0_i32 = arith.constant 0 : i32
    %c0_i32_0 = arith.constant 0 : i32
    return %c0_i32, %arg0 : i32, i32
  }
  func.func @transform_1(%arg0: i32) -> (i32, i32) {
    %c0_i32 = arith.constant 0 : i32
    %c0_i32_0 = arith.constant 0 : i32
    return %c0_i32, %arg0 : i32, i32
  }
  func.func @transform_2(%arg0: i32) -> (i32, i32, i32) {
    %c0_i32 = arith.constant 0 : i32
    %c0_i32_0 = arith.constant 0 : i32
    %c0_i32_1 = arith.constant 0 : i32
    %c0_i32_2 = arith.constant 0 : i32
    return %c0_i32, %c0_i32_0, %c0_i32_1 : i32, i32, i32
  }
  func.func @transform_3(%arg0: i32) -> (i32, i32, i32) {
    %c0_i32 = arith.constant 0 : i32
    %c0_i32_0 = arith.constant 0 : i32
    %c0_i32_1 = arith.constant 0 : i32
    %c0_i32_2 = arith.constant 0 : i32
    return %c0_i32, %c0_i32_0, %c0_i32_1 : i32, i32, i32
  }
  func.func @transform_4(%arg0: i32) -> (i32, i32) {
    %c0_i32 = arith.constant 0 : i32
    %c0_i32_0 = arith.constant 0 : i32
    return %c0_i32, %arg0 : i32, i32
  }
}

</mosaic_0001>

<bundles_post_ra>
// kernel: tpu_custom_call.1
= control target key start
LH: loop header
LB: loop body
LE: loop exit
PB: predicated region body
PF: predicated region fallthrough
CT: control target
= control target key end

     0   :  { %9 = vsyncpa [#allocation3], 0  ;;  %s1836_s0 = inlined_call_operand.hbm [shape: s32[1,128], index: 0, kind: input, shape index: {}]   ;;  %s1837_s1 = inlined_call_operand.vmem [shape: s32[1,128], index: 1, kind: input, shape index: {}]   ;;  %s1838_s2 = inlined_call_operand.hbm [shape: bf16[3,56,128], index: 2, kind: input, shape index: {}]   ;;  %s1839_s3 = inlined_call_operand.hbm [shape: bf16[3,56,128], index: 3, kind: input, shape index: {}]   ;;  %s1840_s4 = inlined_call_operand.hbm [shape: f32[1,128], index: 4, kind: output, shape index: {}]  }
   0x1   :  { %10 = vsyncpa [#allocation6], 0 }
   0x2   :  { %11 = vsyncpa [#allocation4], 0  ;;  %s1336_s15 = smov [#allocation5]   ;;  %s1242_s19 = scalar_lea.hbm %s1838_s2, 1344 }
   0x3   :  { %s29_s16 = sshll.u32 %s1336_s15, 4  ;;  %p1243_p0 = scmp.ne.s32.totalorder %s1838_s2, %s1242_s19  ;;  %s30_s16 = int_to_ptr.vmem [resolvable:$true] %s29_s16 }
   0x4   :  { %p1246_p1 = scmp.lt.u32.totalorder %s1242_s19, %s1838_s2 }
   0x6   :  { %p1248_p2 = pnand %p1246_p1, %p1243_p0 }
   0x8   :  { %1251 = shalt.err (!%p1248_p2)
}
   0x9   :  { %s1252_s24 = scalar_lea.vmem %s30_s16, 1344  ;;  %p1257_p4 = scmp.lt.s32.totalorder %s30_s16, %s30_s16 }
   0xa   :  { %p1253_p3 = scmp.ne.s32.totalorder %s30_s16, %s1252_s24  ;;  %p1258_p5 = scmp.lt.s32.totalorder %s1252_s24, %s1252_s24 }
   0xc   :  { %p1259_p6 = por %p1258_p5, %p1257_p4 }
   0xe   :  { %p1260_p7 = pnand %p1259_p6, %p1253_p3 }
  0x10   :  { %1263 = shalt.err (!%p1260_p7)
}
  0x11   :  { %s1337_s25 = smov 64   ;;  %s1338_s26 = smov 4  }
  0x12   :  { %35 = dma.hbm_to_vmem [thread:$0]  %s1838_s2, 1344, %s30_s16, [#allocation6], %s1337_s25, %s1337_s25, %s1338_s26  }
  0x13   :  { %s1339_s29 = smov [#allocation2]   ;;  %s1340_s5 = smov [#allocation7]  }
  0x14   :  { %s18_s30 = sshll.u32 %s1339_s29, 4  ;;  %s41_s6 = sshll.u32 %s1340_s5, 4  ;;  %s19_s30 = int_to_ptr.vmem [resolvable:$true] %s18_s30  ;;  %s42_s6 = int_to_ptr.vmem [resolvable:$true] %s41_s6 }
  0x15   :  { %s1264_s9 = scalar_lea.hbm %s1836_s0, 16 }
  0x16   :  { %p1265_p8 = scmp.ne.s32.totalorder %s1836_s0, %s1264_s9  ;;  %p1268_p9 = scmp.lt.u32.totalorder %s1264_s9, %s1836_s0 }
  0x18   :  { %p1270_p10 = pnand %p1268_p9, %p1265_p8 }
  0x1a   :  { %1273 = shalt.err (!%p1270_p10)
}
  0x1b   :  { %s1274_s2 = scalar_lea.vmem %s19_s30, 16  ;;  %s1278_s14 = scalar_lea.vmem %s19_s30, 32 }
  0x1c   :  { %p1275_p11 = scmp.ne.s32.totalorder %s19_s30, %s1274_s2  ;;  %p1279_p12 = scmp.lt.s32.totalorder %s19_s30, %s19_s30 }
  0x1d   :  { %p1280_p13 = scmp.lt.s32.totalorder %s1278_s14, %s1274_s2 }
  0x1f   :  { %p1281_p0 = por %p1280_p13, %p1279_p12 }
  0x21   :  { %p1282_p1 = pnand %p1281_p0, %p1275_p11 }
  0x23   :  { %1285 = shalt.err (!%p1282_p1)
}
  0x24   :  { %21 = dma.hbm_to_vmem [thread:$0]  %s1836_s0, 16, %s19_s30, [#allocation3]  }
  0x25   :  { %s1286_s19 = scalar_lea.hbm %s1839_s3, 1344 }
  0x26   :  { %p1287_p2 = scmp.ne.s32.totalorder %s1839_s3, %s1286_s19  ;;  %p1290_p3 = scmp.lt.u32.totalorder %s1286_s19, %s1839_s3 }
  0x28   :  { %p1292_p4 = pnand %p1290_p3, %p1287_p2 }
  0x2a   :  { %1295 = shalt.err (!%p1292_p4)
}
  0x2b   :  { %s1296_s24 = scalar_lea.vmem %s42_s6, 1344  ;;  %p1301_p6 = scmp.lt.s32.totalorder %s42_s6, %s42_s6 }
  0x2c   :  { %p1297_p5 = scmp.ne.s32.totalorder %s42_s6, %s1296_s24  ;;  %p1302_p7 = scmp.lt.s32.totalorder %s1296_s24, %s1296_s24 }
  0x2e   :  { %p1303_p8 = por %p1302_p7, %p1301_p6 }
  0x30   :  { %p1304_p9 = pnand %p1303_p8, %p1297_p5 }
  0x32   :  { %1307 = shalt.err (!%p1304_p9)
}
  0x33   :  { %47 = dma.hbm_to_vmem [thread:$0]  %s1839_s3, 1344, %s42_s6, [#allocation6], %s1337_s25, %s1337_s25, %s1338_s26  }
  0x34   :  { %1330 = dma.done.wait [#allocation3], 16  }
  0x35   :  { %1331 = vsyncadd [#allocation3], 4294967280 }
  0x36   :  { %1332 = dma.done.wait [#allocation6], 2688  }
  0x37   :  { %1333 = vsyncadd [#allocation6], 4294964608  ;;  %v60_v0 = vlaneseq  ;;  %v1417_v7 = vld [vmem:[#allocation2] ss:$0 sm:$0xff]  ;;  %v1341_v10 = vmov 1.0|1.0  }
  0x38   :  { %v1422_v8 = vld [vmem:[%s1837_s1] ss:$0 sm:$0xff]  ;;  %v1861_v17 = vmov 0  ;;  %v1219_v18 = vld [vmem:[#allocation7 + $0x1c] sm:$0xff]   ;;  %v1863_v19 = vmov 0  ;;  %v1865_v22 = vmov 0 }
  0x39   :  { %v1410_v1 = vshrl.u32 %v60_v0, 7  ;;  %v1218_v14 = vld [vmem:[#allocation5 + $0x1c] sm:$0xff]   ;;  %1099 = vmatprep.mubr.bf16.mxu1 %v1219_v18  ;;  %v1867_v23 = vmov 0  ;;  %v1869_v26 = vmov 0  ;;  %v1871_v27 = vmov 0  ;;  %v1220_v38 = vld [vmem:[#allocation5 + $0x24] sm:$0xff]  }
  0x3a   :  { %1051 = vmatprep.mubr.bf16.mxu0 %v1218_v14  ;;  %v1221_v39 = vld [vmem:[#allocation7 + $0x24] sm:$0xff]   ;;  %v1222_v40 = vld [vmem:[#allocation5 + $0x2c] sm:$0xff]   ;;  %v1223_v41 = vld [vmem:[#allocation7 + $0x2c] sm:$0xff]   ;;  %s1342_s1 = smov [#allocation8]  }
  0x3b   :  { %v62_v2 = vadd.s32 8, %v1410_v1  ;;  %v63_v3 = vadd.s32 16, %v1410_v1  ;;  %v64_v4 = vadd.s32 24, %v1410_v1  ;;  %v65_v5 = vadd.s32 32, %v1410_v1  ;;  %v1224_v42 = vld [vmem:[#allocation5 + $0x34] ss:$0 sps:$4 sm:$0xff]  }
  0x3c   :  { %v66_v6 = vadd.s32 40, %v1410_v1  ;;  %vm81_vm0 = vcmp.eq.s32.totalorder %v1410_v1, %v1417_v7  ;;  %vm141_vm2 = vcmp.eq.s32.totalorder %v1410_v1, %v1422_v8  ;;  %v67_v12 = vadd.s32 48, %v1410_v1  ;;  %v1225_v43 = vld [vmem:[#allocation7 + $0x34] ss:$0 sps:$4 sm:$0xff]   ;;  %v1226_v44 = vld [vmem:[#allocation5] sm:$0xff]   ;;  %v1227_v45 = vld [vmem:[#allocation7] sm:$0xff]  }
  0x3d   :  { %vm82_vm1 = vcmp.eq.s32.totalorder %v62_v2, %v1417_v7  ;;  %vm142_vm3 = vcmp.eq.s32.totalorder %v62_v2, %v1422_v8  ;;  %vm83_vm5 = vcmp.eq.s32.totalorder %v63_v3, %v1417_v7  ;;  %vm84_vm6 = vcmp.eq.s32.totalorder %v64_v4, %v1417_v7  ;;  %v1228_v46 = vld [vmem:[#allocation5 + $0x8] sm:$0xff]   ;;  %v1229_v47 = vld [vmem:[#allocation7 + $0x8] sm:$0xff]   ;;  %v1230_v48 = vld [vmem:[#allocation5 + $0x10] sm:$0xff]   ;;  %s799_s26 = sshll.u32 %s1342_s1, 4  ;;  %s800_s26 = int_to_ptr.vmem [resolvable:$true] %s799_s26 }
  0x3e   :  { %vm1430_vm4 = vmpackc.low %vm82_vm1, %vm81_vm0  ;;  %vm143_vm7 = vcmp.eq.s32.totalorder %v63_v3, %v1422_v8  ;;  %vm144_vm8 = vcmp.eq.s32.totalorder %v64_v4, %v1422_v8  ;;  %vm85_vm10 = vcmp.eq.s32.totalorder %v65_v5, %v1417_v7  ;;  %vm86_vm11 = vcmp.eq.s32.totalorder %v66_v6, %v1417_v7  ;;  %v1231_v49 = vld [vmem:[#allocation7 + $0x10] sm:$0xff]   ;;  %v1232_v50 = vld [vmem:[#allocation5 + $0x18] ss:$0 sps:$4 sm:$0xff]   ;;  %s1308_s28 = scalar_lea.vmem %s800_s26, 16  ;;  %s1312_s29 = scalar_lea.vmem %s800_s26, 32 }
  0x3f   :  { %1035 = vmatprep.subr.msk.bf16.mxu0 %vm1430_vm4, %v1341_v10  ;;  %vm1441_vm9 = vmpackc.low %vm142_vm3, %vm141_vm2  ;;  %v68_v13 = vadd.s32 56, %v1410_v1  ;;  %vm145_vm13 = vcmp.eq.s32.totalorder %v65_v5, %v1422_v8  ;;  %vm146_vm14 = vcmp.eq.s32.totalorder %v66_v6, %v1422_v8  ;;  %vm87_vm2 = vcmp.eq.s32.totalorder %v67_v12, %v1417_v7  ;;  %v1233_v51 = vld [vmem:[#allocation7 + $0x18] ss:$0 sps:$4 sm:$0xff]   ;;  %v1234_v52 = vld [vmem:[#allocation5 + $0x38] sm:$0xff]   ;;  %p1309_p10 = scmp.ne.s32.totalorder %s800_s26, %s1308_s28  ;;  %p1313_p11 = scmp.lt.s32.totalorder %s800_s26, %s800_s26 }
  0x40   :  { %1083 = vmatprep.subr.msk.bf16.mxu1 %vm1441_vm9, %v1341_v10  ;;  %1036 = vmatpush3.bf16.msk.msra.mxu0 %vm1430_vm4, %v1341_v10  ;;  %vm1455_vm12 = vmpackc.low %vm84_vm6, %vm83_vm5  ;;  %v69_v20 = vadd.s32 64, %v1410_v1  ;;  %v70_v21 = vadd.s32 72, %v1410_v1  ;;  %vm147_vm5 = vcmp.eq.s32.totalorder %v67_v12, %v1422_v8  ;;  %v71_v24 = vadd.s32 80, %v1410_v1  ;;  %v1235_v53 = vld [vmem:[#allocation7 + $0x38] sm:$0xff]   ;;  %v1236_v54 = vld [vmem:[#allocation5 + $0x40] sm:$0xff]   ;;  %p1314_p12 = scmp.lt.s32.totalorder %s1312_s29, %s1308_s28 }
  0x41   :  { %1084 = vmatpush3.bf16.msk.msra.mxu1 %vm1441_vm9, %v1341_v10  ;;  %1037 = vmatprep.subr.msk.bf16.mxu0 %vm1455_vm12, %v1341_v10  ;;  %vm1471_vm15 = vmpackc.low %vm144_vm8, %vm143_vm7  ;;  %vm88_vm3 = vcmp.eq.s32.totalorder %v68_v13, %v1417_v7  ;;  %vm148_vm6 = vcmp.eq.s32.totalorder %v68_v13, %v1422_v8  ;;  %v72_v25 = vadd.s32 88, %v1410_v1  ;;  %v73_v28 = vadd.s32 96, %v1410_v1  ;;  %v1237_v55 = vld [vmem:[#allocation7 + $0x40] sm:$0xff]   ;;  %v1238_v56 = vld [vmem:[#allocation5 + $0x48] sm:$0xff]  }
  0x42   :  { %1085 = vmatprep.subr.msk.bf16.mxu1 %vm1471_vm15, %v1341_v10  ;;  %vm1478_vm0 = vmpackc.low %vm86_vm11, %vm85_vm10  ;;  %vm89_vm10 = vcmp.eq.s32.totalorder %v69_v20, %v1417_v7  ;;  %vm90_vm11 = vcmp.eq.s32.totalorder %v70_v21, %v1417_v7  ;;  %v74_v29 = vadd.s32 104, %v1410_v1  ;;  %v75_v32 = vadd.s32 112, %v1410_v1  ;;  %v1239_v57 = vld [vmem:[#allocation7 + $0x48] sm:$0xff]   ;;  %v1240_v58 = vld [vmem:[#allocation5 + $0x50] ss:$0 sps:$4 sm:$0xff]   ;;  %p1315_p13 = por %p1314_p12, %p1313_p11 }
  0x43   :  { %v1862_v17 = vsel %vm1478_vm0, 4294967295, %v1861_v17  ;;  %vm1482_vm1 = vmpackc.low %vm146_vm14, %vm145_vm13  ;;  %vm149_vm13 = vcmp.eq.s32.totalorder %v69_v20, %v1422_v8  ;;  %vm150_vm14 = vcmp.eq.s32.totalorder %v70_v21, %v1422_v8  ;;  %v76_v33 = vadd.s32 120, %v1410_v1  ;;  %v1241_v59 = vld [vmem:[#allocation7 + $0x50] ss:$0 sps:$4 sm:$0xff]  }
  0x44   :  { %v1864_v19 = vsel %vm1482_vm1, 4294967295, %v1863_v19  ;;  %1038 = vmatpush3.bf16.msk.msra.mxu0 %vm1455_vm12, %v1341_v10  ;;  %vm1504_vm7 = vmpackc.low %vm88_vm3, %vm87_vm2  ;;  %p1316_p0 = pnand %p1315_p13, %p1309_p10 }
  0x45   :  { %1086 = vmatpush3.bf16.msk.msra.mxu1 %vm1471_vm15, %v1341_v10  ;;  %1039 = vmatprep.subr.msk.bf16.mxu0 %vm1478_vm0, %v1341_v10  ;;  %v1866_v22 = vsel %vm1504_vm7, 4294967295, %v1865_v22  ;;  %vm1508_vm8 = vmpackc.low %vm148_vm6, %vm147_vm5  ;;  %vm91_vm5 = vcmp.eq.s32.totalorder %v71_v24, %v1417_v7  ;;  %vm92_vm6 = vcmp.eq.s32.totalorder %v72_v25, %v1417_v7 }
  0x46   :  { %1087 = vmatprep.subr.msk.bf16.mxu1 %vm1482_vm1, %v1341_v10  ;;  %v1868_v23 = vsel %vm1508_vm8, 4294967295, %v1867_v23  ;;  %vm1530_vm2 = vmpackc.low %vm90_vm11, %vm89_vm10  ;;  %vm151_vm10 = vcmp.eq.s32.totalorder %v71_v24, %v1422_v8  ;;  %vm152_vm11 = vcmp.eq.s32.totalorder %v72_v25, %v1422_v8 }
  0x47   :  { %v1870_v26 = vsel %vm1530_vm2, 4294967295, %v1869_v26  ;;  %vm1534_vm3 = vmpackc.low %vm150_vm14, %vm149_vm13 }
  0x48   :  { %1040 = vmatpush3.bf16.msk.msra.mxu0 %vm1478_vm0, %v1341_v10  ;;  %v1872_v27 = vsel %vm1534_vm3, 4294967295, %v1871_v27  ;;  %vm1556_vm13 = vmpackc.low %vm92_vm6, %vm91_vm5  ;;  %vm153_vm5 = vcmp.eq.s32.totalorder %v73_v28, %v1422_v8  ;;  %vm154_vm6 = vcmp.eq.s32.totalorder %v74_v29, %v1422_v8  ;;  %vm156_vm0 = vcmp.eq.s32.totalorder %v76_v33, %v1422_v8 }
  0x49   :  { %1088 = vmatpush3.bf16.msk.msra.mxu1 %vm1482_vm1, %v1341_v10  ;;  %1041 = vmatprep.subr.msk.bf16.mxu0 %vm1504_vm7, %v1341_v10  ;;  %vm1560_vm14 = vmpackc.low %vm152_vm11, %vm151_vm10  ;;  %vm155_vm1 = vcmp.eq.s32.totalorder %v75_v32, %v1422_v8 }
  0x4a   :  { %1089 = vmatprep.subr.msk.bf16.mxu1 %vm1508_vm8, %v1341_v10  ;;  %vm1586_vm11 = vmpackc.low %vm154_vm6, %vm153_vm5  ;;  %vm1889_vm5 = vnez %v1870_v26  ;;  %vm1890_vm6 = vnez %v1872_v27 }
  0x4c   :  { %1042 = vmatpush3.bf16.msk.msra.mxu0 %vm1504_vm7, %v1341_v10  ;;  %vm93_vm7 = vcmp.eq.s32.totalorder %v73_v28, %v1417_v7 }
  0x4d   :  { %1090 = vmatpush3.bf16.msk.msra.mxu1 %vm1508_vm8, %v1341_v10  ;;  %1043 = vmatprep.subr.msk.bf16.mxu0 %vm1530_vm2, %v1341_v10  ;;  %vm94_vm8 = vcmp.eq.s32.totalorder %v74_v29, %v1417_v7 }
  0x4e   :  { %1091 = vmatprep.subr.msk.bf16.mxu1 %vm1534_vm3, %v1341_v10  ;;  %vm1582_vm10 = vmpackc.low %vm94_vm8, %vm93_vm7 }
  0x4f   :  { %vm1610_vm8 = vmpackc.low %vm156_vm0, %vm155_vm1  ;;  %vm1885_vm0 = vnez %v1862_v17  ;;  %vm1886_vm1 = vnez %v1864_v19 }
  0x50   :  { %1044 = vmatpush3.bf16.msk.msra.mxu0 %vm1530_vm2, %v1341_v10  ;;  %vm95_vm2 = vcmp.eq.s32.totalorder %v75_v32, %v1417_v7 }
  0x51   :  { %1092 = vmatpush3.bf16.msk.msra.mxu1 %vm1534_vm3, %v1341_v10  ;;  %1045 = vmatprep.subr.msk.bf16.mxu0 %vm1556_vm13, %v1341_v10  ;;  %vm96_vm3 = vcmp.eq.s32.totalorder %v76_v33, %v1417_v7 }
  0x52   :  { %1093 = vmatprep.subr.msk.bf16.mxu1 %vm1560_vm14, %v1341_v10  ;;  %vm1606_vm7 = vmpackc.low %vm96_vm3, %vm95_vm2  ;;  %vm1887_vm2 = vnez %v1866_v22  ;;  %vm1888_vm3 = vnez %v1868_v23 }
  0x54   :  { %1046 = vmatpush3.bf16.msk.msra.mxu0 %vm1556_vm13, %v1341_v10 }
  0x55   :  { %1094 = vmatpush3.bf16.msk.msra.mxu1 %vm1560_vm14, %v1341_v10  ;;  %1047 = vmatprep.subr.msk.bf16.mxu0 %vm1582_vm10, %v1341_v10 }
  0x56   :  { %1095 = vmatprep.subr.msk.bf16.mxu1 %vm1586_vm11, %v1341_v10 }
  0x58   :  { %1048 = vmatpush3.bf16.msk.msra.mxu0 %vm1582_vm10, %v1341_v10 }
  0x59   :  { %1096 = vmatpush3.bf16.msk.msra.mxu1 %vm1586_vm11, %v1341_v10  ;;  %1049 = vmatprep.subr.msk.bf16.mxu0 %vm1606_vm7, %v1341_v10 }
  0x5a   :  { %1097 = vmatprep.subr.msk.bf16.mxu1 %vm1610_vm8, %v1341_v10 }
  0x5c   :  { %1050 = vmatpush3.bf16.msk.msra.mxu0 %vm1606_vm7, %v1341_v10 }
  0x5d   :  { %1098 = vmatpush3.bf16.msk.msra.mxu1 %vm1610_vm8, %v1341_v10  ;;  %1059 = vmatprep.subr.msk.bf16.mxu0 %vm1430_vm4, %v1341_v10 }
  0x5e   :  { %1107 = vmatprep.subr.msk.bf16.mxu1 %vm1441_vm9, %v1341_v10 }
  0x5f   :  { %1052 = vmatmul.mubr.bf16.vlgmr.msra.gmra.mrb[0].mxu0 %v1220_v38 }
  0x60   :  { %1060 = vmatpush3.bf16.msk.msra.mxu0 %vm1430_vm4, %v1341_v10  ;;  %1100 = vmatmul.mubr.bf16.vlgmr.msra.gmra.mrb[0].mxu1 %v1221_v39 }
  0x61   :  { %1108 = vmatpush3.bf16.msk.msra.mxu1 %vm1441_vm9, %v1341_v10  ;;  %1061 = vmatprep.subr.msk.bf16.mxu0 %vm1455_vm12, %v1341_v10 }
  0x62   :  { %1109 = vmatprep.subr.msk.bf16.mxu1 %vm1471_vm15, %v1341_v10  ;;  %1055 = vmatprep.mubr.bf16.mxu0 %v1222_v40 }
  0x63   :  { %1103 = vmatprep.mubr.bf16.mxu1 %v1223_v41 }
  0x64   :  { %1062 = vmatpush3.bf16.msk.msra.mxu0 %vm1455_vm12, %v1341_v10 }
  0x65   :  { %1110 = vmatpush3.bf16.msk.msra.mxu1 %vm1471_vm15, %v1341_v10  ;;  %1063 = vmatprep.subr.msk.bf16.mxu0 %vm1885_vm0, %v1341_v10 }
  0x66   :  { %1111 = vmatprep.subr.msk.bf16.mxu1 %vm1886_vm1, %v1341_v10 }
  0x67   :  { %1056 = vmatmul.mubr.bf16.gmra.mrb[4].mxu0 %v1224_v42 }
  0x68   :  { %1064 = vmatpush3.bf16.msk.msra.mxu0 %vm1885_vm0, %v1341_v10  ;;  %1104 = vmatmul.mubr.bf16.gmra.mrb[4].mxu1 %v1225_v43 }
  0x69   :  { %1112 = vmatpush3.bf16.msk.msra.mxu1 %vm1886_vm1, %v1341_v10  ;;  %1065 = vmatprep.subr.msk.bf16.mxu0 %vm1887_vm2, %v1341_v10 }
  0x6a   :  { %1113 = vmatprep.subr.msk.bf16.mxu1 %vm1888_vm3, %v1341_v10  ;;  %1075 = vmatprep.mubr.bf16.mxu0 %v1226_v44 }
  0x6b   :  { %1123 = vmatprep.mubr.bf16.mxu1 %v1227_v45 }
  0x6c   :  { %1066 = vmatpush3.bf16.msk.msra.mxu0 %vm1887_vm2, %v1341_v10 }
  0x6d   :  { %1114 = vmatpush3.bf16.msk.msra.mxu1 %vm1888_vm3, %v1341_v10  ;;  %1067 = vmatprep.subr.msk.bf16.mxu0 %vm1889_vm5, %v1341_v10 }
  0x6e   :  { %1115 = vmatprep.subr.msk.bf16.mxu1 %vm1890_vm6, %v1341_v10 }
  0x70   :  { %1068 = vmatpush3.bf16.msk.msra.mxu0 %vm1889_vm5, %v1341_v10 }
  0x71   :  { %1116 = vmatpush3.bf16.msk.msra.mxu1 %vm1890_vm6, %v1341_v10  ;;  %1069 = vmatprep.subr.msk.bf16.mxu0 %vm1556_vm13, %v1341_v10 }
  0x72   :  { %1117 = vmatprep.subr.msk.bf16.mxu1 %vm1560_vm14, %v1341_v10 }
  0x74   :  { %1070 = vmatpush3.bf16.msk.msra.mxu0 %vm1556_vm13, %v1341_v10 }
  0x75   :  { %1118 = vmatpush3.bf16.msk.msra.mxu1 %vm1560_vm14, %v1341_v10  ;;  %1071 = vmatprep.subr.msk.bf16.mxu0 %vm1582_vm10, %v1341_v10 }
  0x76   :  { %1119 = vmatprep.subr.msk.bf16.mxu1 %vm1586_vm11, %v1341_v10 }
  0x78   :  { %1072 = vmatpush3.bf16.msk.msra.mxu0 %vm1582_vm10, %v1341_v10 }
  0x79   :  { %1120 = vmatpush3.bf16.msk.msra.mxu1 %vm1586_vm11, %v1341_v10  ;;  %1073 = vmatprep.subr.msk.bf16.mxu0 %vm1606_vm7, %v1341_v10 }
  0x7a   :  { %1121 = vmatprep.subr.msk.bf16.mxu1 %vm1610_vm8, %v1341_v10 }
  0x7c   :  { %1074 = vmatpush3.bf16.msk.msra.mxu0 %vm1606_vm7, %v1341_v10 }
  0x7d   :  { %1122 = vmatpush3.bf16.msk.msra.mxu1 %vm1610_vm8, %v1341_v10  ;;  %1131 = vmatprep.subr.msk.bf16.mxu0 %vm1430_vm4, %v1341_v10 }
  0x7e   :  { %1155 = vmatprep.subr.msk.bf16.mxu1 %vm1441_vm9, %v1341_v10 }
  0x7f   :  { %1076 = vmatmul.mubr.bf16.vlgmr.msra.gmra.mrb[0].mxu0 %v1228_v46 }
  0x80   :  { %1124 = vmatmul.mubr.bf16.vlgmr.msra.gmra.mrb[0].mxu1 %v1229_v47  ;;  %1132 = vmatpush3.bf16.msk.msra.mxu0 %vm1430_vm4, %v1341_v10 }
  0x81   :  { %1156 = vmatpush3.bf16.msk.msra.mxu1 %vm1441_vm9, %v1341_v10  ;;  %1133 = vmatprep.subr.msk.bf16.mxu0 %vm1455_vm12, %v1341_v10 }
  0x82   :  { %1157 = vmatprep.subr.msk.bf16.mxu1 %vm1471_vm15, %v1341_v10  ;;  %1079 = vmatprep.mubr.bf16.mxu0 %v1230_v48 }
  0x83   :  { %1127 = vmatprep.mubr.bf16.mxu1 %v1231_v49 }
  0x84   :  { %1134 = vmatpush3.bf16.msk.msra.mxu0 %vm1455_vm12, %v1341_v10 }
  0x85   :  { %1158 = vmatpush3.bf16.msk.msra.mxu1 %vm1471_vm15, %v1341_v10  ;;  %1135 = vmatprep.subr.msk.bf16.mxu0 %vm1885_vm0, %v1341_v10 }
  0x86   :  { %1159 = vmatprep.subr.msk.bf16.mxu1 %vm1886_vm1, %v1341_v10 }
  0x87   :  { %1080 = vmatmul.mubr.bf16.gmra.mrb[4].mxu0 %v1232_v50 }
  0x88   :  { %1136 = vmatpush3.bf16.msk.msra.mxu0 %vm1885_vm0, %v1341_v10  ;;  %1128 = vmatmul.mubr.bf16.gmra.mrb[4].mxu1 %v1233_v51 }
  0x89   :  { %1160 = vmatpush3.bf16.msk.msra.mxu1 %vm1886_vm1, %v1341_v10  ;;  %1137 = vmatprep.subr.msk.bf16.mxu0 %vm1887_vm2, %v1341_v10 }
  0x8a   :  { %1161 = vmatprep.subr.msk.bf16.mxu1 %vm1888_vm3, %v1341_v10  ;;  %1147 = vmatprep.mubr.bf16.mxu0 %v1234_v52 }
  0x8b   :  { %1171 = vmatprep.mubr.bf16.mxu1 %v1235_v53 }
  0x8c   :  { %1138 = vmatpush3.bf16.msk.msra.mxu0 %vm1887_vm2, %v1341_v10 }
  0x8d   :  { %1162 = vmatpush3.bf16.msk.msra.mxu1 %vm1888_vm3, %v1341_v10  ;;  %1139 = vmatprep.subr.msk.bf16.mxu0 %vm1889_vm5, %v1341_v10 }
  0x8e   :  { %1163 = vmatprep.subr.msk.bf16.mxu1 %vm1890_vm6, %v1341_v10 }
  0x90   :  { %1140 = vmatpush3.bf16.msk.msra.mxu0 %vm1889_vm5, %v1341_v10 }
  0x91   :  { %1164 = vmatpush3.bf16.msk.msra.mxu1 %vm1890_vm6, %v1341_v10  ;;  %1141 = vmatprep.subr.msk.bf16.mxu0 %vm1556_vm13, %v1341_v10 }
  0x92   :  { %1165 = vmatprep.subr.msk.bf16.mxu1 %vm1560_vm14, %v1341_v10 }
  0x94   :  { %1142 = vmatpush3.bf16.msk.msra.mxu0 %vm1556_vm13, %v1341_v10 }
  0x95   :  { %1166 = vmatpush3.bf16.msk.msra.mxu1 %vm1560_vm14, %v1341_v10  ;;  %1143 = vmatprep.subr.msk.bf16.mxu0 %vm1582_vm10, %v1341_v10 }
  0x96   :  { %1167 = vmatprep.subr.msk.bf16.mxu1 %vm1586_vm11, %v1341_v10 }
  0x98   :  { %1144 = vmatpush3.bf16.msk.msra.mxu0 %vm1582_vm10, %v1341_v10 }
  0x99   :  { %1168 = vmatpush3.bf16.msk.msra.mxu1 %vm1586_vm11, %v1341_v10  ;;  %1145 = vmatprep.subr.msk.bf16.mxu0 %vm1606_vm7, %v1341_v10 }
  0x9a   :  { %1169 = vmatprep.subr.msk.bf16.mxu1 %vm1610_vm8, %v1341_v10 }
  0x9c   :  { %1146 = vmatpush3.bf16.msk.msra.mxu0 %vm1606_vm7, %v1341_v10 }
  0x9d   :  { %1170 = vmatpush3.bf16.msk.msra.mxu1 %vm1610_vm8, %v1341_v10 }
  0x9f   :  { %1148 = vmatmul.mubr.bf16.vlgmr.msra.gmra.mrb[0].mxu0 %v1236_v54 }
  0xa0   :  { %1172 = vmatmul.mubr.bf16.vlgmr.msra.gmra.mrb[0].mxu1 %v1237_v55  ;;  %1151 = vmatprep.mubr.bf16.mxu0 %v1238_v56 }
  0xa1   :  { %1175 = vmatprep.mubr.bf16.mxu1 %v1239_v57 }
  0xa7   :  { %1152 = vmatmul.mubr.bf16.gmra.mrb[4].mxu0 %v1240_v58 }
  0xa8   :  { %1176 = vmatmul.mubr.bf16.gmra.mrb[4].mxu1 %v1241_v59 }
 0x172   :  { %v1149_v60 = vpop.f32.mrb[0].mxu0 }
 0x173   :  { %v1173_v61 = vpop.f32.mrb[0].mxu1  ;;  %v635_v62 = vpop.f32.mrb[1].mxu0 }
 0x174   :  { %v775_v63 = vmul.f32 %v1173_v61, %v1149_v60  ;;  %v736_v0 = vpop.f32.mrb[1].mxu1  ;;  %v1150_v1 = vpop.f32.mrb[2].mxu0 }
 0x175   :  { %v773_v2 = vmul.f32 %v736_v0, %v635_v62  ;;  %v1174_v3 = vpop.f32.mrb[2].mxu1  ;;  %v638_v4 = vpop.f32.mrb[3].mxu0 }
 0x176   :  { %v776_v5 = vmul.f32 %v1174_v3, %v1150_v1  ;;  %v739_v6 = vpop.f32.mrb[3].mxu1 }
 0x177   :  { %v774_v7 = vmul.f32 %v739_v6, %v638_v4 }
 0x179   :  { %v780_v8 = vadd.f32 %v774_v7, %v773_v2 }
 0x17a   :  { %v1153_v9 = vpop.f32.mrb[4].mxu0 }
 0x17b   :  { %v781_v10 = vadd.f32 %v780_v8, %v775_v63  ;;  %v1177_v11 = vpop.f32.mrb[4].mxu1  ;;  %v651_v12 = vpop.f32.mrb[5].mxu0 }
 0x17c   :  { %v779_v13 = vmul.f32 %v1177_v11, %v1153_v9  ;;  %v752_v14 = vpop.f32.mrb[5].mxu1  ;;  %v1154_v15 = vpop.f32.mrb[6].mxu0 }
 0x17d   :  { %v777_v16 = vmul.f32 %v752_v14, %v651_v12  ;;  %v782_v17 = vadd.f32 %v781_v10, %v776_v5  ;;  %v1178_v18 = vpop.f32.mrb[6].mxu1  ;;  %v654_v19 = vpop.f32.mrb[7].mxu0 }
 0x17e   :  { %v755_v20 = vpop.f32.mrb[7].mxu1 }
 0x17f   :  { %v783_v21 = vadd.f32 %v782_v17, %v777_v16  ;;  %v778_v22 = vmul.f32 %v755_v20, %v654_v19 }
 0x181   :  { %v784_v23 = vadd.f32 %v783_v21, %v778_v22 }
 0x183   :  { %v785_v24 = vadd.f32 %v784_v23, %v779_v13 }
 0x185   :  { %v786_v25 = vrot.slane %v785_v24, 4 }
 0x187   :  { %v787_v26 = vadd.f32 %v786_v25, %v785_v24 }
 0x189   :  { %v788_v27 = vrot.slane %v787_v26, 2 }
 0x18b   :  { %v789_v28 = vadd.f32 %v788_v27, %v787_v26 }
 0x18d   :  { %v790_v29 = vrot.slane %v789_v28, 1 }
 0x18f   :  { %v791_v30 = vadd.f32 %v790_v29, %v789_v28 }
 0x191   :  { %792 = vst [vmem:[#allocation8] sm:$0x1] %v791_v30 }
 0x192   :  { %1319 = shalt.err (!%p1316_p0)
}
 0x193   :  { %s1320_s6 = scalar_lea.hbm %s1840_s4, 16 }
 0x194   :  { %p1321_p1 = scmp.ne.s32.totalorder %s1840_s4, %s1320_s6  ;;  %p1324_p2 = scmp.lt.u32.totalorder %s1320_s6, %s1840_s4 }
 0x196   :  { %p1326_p3 = pnand %p1324_p2, %p1321_p1 }
 0x198   :  { %1329 = shalt.err (!%p1326_p3)
}
 0x199   :  { %802 = dma.vmem_to_hbm [thread:$0]  %s800_s26, 16, %s1840_s4, [#allocation4]  }
 0x19a   :  { %1334 = dma.done.wait [#allocation4], 16  }
 0x19b   :  { %1335 = vsyncadd [#allocation4], 4294967280 }
 0x19c   :  { %806 = vsyncpa [#allocation3], 1 }
 0x19d   :  { %807 = vsyncpa [#allocation6], 1 }
 0x19e   :  { %808 = vsyncpa [#allocation4], 1 }

// kernel: tpu_custom_call.1
= control target key start
LH: loop header
LB: loop body
LE: loop exit
PB: predicated region body
PF: predicated region fallthrough
CT: control target
= control target key end

     0   :  { %9 = vsyncpa [#allocation3], 0  ;;  %s1836_s0 = inlined_call_operand.hbm [shape: s32[1,128], index: 0, kind: input, shape index: {}]   ;;  %s1837_s1 = inlined_call_operand.vmem [shape: s32[1,128], index: 1, kind: input, shape index: {}]   ;;  %s1838_s2 = inlined_call_operand.hbm [shape: bf16[3,56,128], index: 2, kind: input, shape index: {}]   ;;  %s1839_s3 = inlined_call_operand.hbm [shape: bf16[3,56,128], index: 3, kind: input, shape index: {}]   ;;  %s1840_s4 = inlined_call_operand.hbm [shape: f32[1,128], index: 4, kind: output, shape index: {}]  }
   0x1   :  { %10 = vsyncpa [#allocation6], 0 }
   0x2   :  { %11 = vsyncpa [#allocation4], 0  ;;  %s1336_s15 = smov [#allocation5]   ;;  %s1242_s19 = scalar_lea.hbm %s1838_s2, 1344 }
   0x3   :  { %s29_s16 = sshll.u32 %s1336_s15, 4  ;;  %p1243_p0 = scmp.ne.s32.totalorder %s1838_s2, %s1242_s19  ;;  %s30_s16 = int_to_ptr.vmem [resolvable:$true] %s29_s16 }
   0x4   :  { %p1246_p1 = scmp.lt.u32.totalorder %s1242_s19, %s1838_s2 }
   0x6   :  { %p1248_p2 = pnand %p1246_p1, %p1243_p0 }
   0x8   :  { %1251 = shalt.err (!%p1248_p2)
}
   0x9   :  { %s1252_s24 = scalar_lea.vmem %s30_s16, 1344  ;;  %p1257_p4 = scmp.lt.s32.totalorder %s30_s16, %s30_s16 }
   0xa   :  { %p1253_p3 = scmp.ne.s32.totalorder %s30_s16, %s1252_s24  ;;  %p1258_p5 = scmp.lt.s32.totalorder %s1252_s24, %s1252_s24 }
   0xc   :  { %p1259_p6 = por %p1258_p5, %p1257_p4 }
   0xe   :  { %p1260_p7 = pnand %p1259_p6, %p1253_p3 }
  0x10   :  { %1263 = shalt.err (!%p1260_p7)
}
  0x11   :  { %s1337_s25 = smov 64   ;;  %s1338_s26 = smov 4  }
  0x12   :  { %35 = dma.hbm_to_vmem [thread:$0]  %s1838_s2, 1344, %s30_s16, [#allocation6], %s1337_s25, %s1337_s25, %s1338_s26  }
  0x13   :  { %s1339_s29 = smov [#allocation2]   ;;  %s1340_s5 = smov [#allocation7]  }
  0x14   :  { %s18_s30 = sshll.u32 %s1339_s29, 4  ;;  %s41_s6 = sshll.u32 %s1340_s5, 4  ;;  %s19_s30 = int_to_ptr.vmem [resolvable:$true] %s18_s30  ;;  %s42_s6 = int_to_ptr.vmem [resolvable:$true] %s41_s6 }
  0x15   :  { %s1264_s9 = scalar_lea.hbm %s1836_s0, 16 }
  0x16   :  { %p1265_p8 = scmp.ne.s32.totalorder %s1836_s0, %s1264_s9  ;;  %p1268_p9 = scmp.lt.u32.totalorder %s1264_s9, %s1836_s0 }
  0x18   :  { %p1270_p10 = pnand %p1268_p9, %p1265_p8 }
  0x1a   :  { %1273 = shalt.err (!%p1270_p10)
}
  0x1b   :  { %s1274_s2 = scalar_lea.vmem %s19_s30, 16  ;;  %s1278_s14 = scalar_lea.vmem %s19_s30, 32 }
  0x1c   :  { %p1275_p11 = scmp.ne.s32.totalorder %s19_s30, %s1274_s2  ;;  %p1279_p12 = scmp.lt.s32.totalorder %s19_s30, %s19_s30 }
  0x1d   :  { %p1280_p13 = scmp.lt.s32.totalorder %s1278_s14, %s1274_s2 }
  0x1f   :  { %p1281_p0 = por %p1280_p13, %p1279_p12 }
  0x21   :  { %p1282_p1 = pnand %p1281_p0, %p1275_p11 }
  0x23   :  { %1285 = shalt.err (!%p1282_p1)
}
  0x24   :  { %21 = dma.hbm_to_vmem [thread:$0]  %s1836_s0, 16, %s19_s30, [#allocation3]  }
  0x25   :  { %s1286_s19 = scalar_lea.hbm %s1839_s3, 1344 }
  0x26   :  { %p1287_p2 = scmp.ne.s32.totalorder %s1839_s3, %s1286_s19  ;;  %p1290_p3 = scmp.lt.u32.totalorder %s1286_s19, %s1839_s3 }
  0x28   :  { %p1292_p4 = pnand %p1290_p3, %p1287_p2 }
  0x2a   :  { %1295 = shalt.err (!%p1292_p4)
}
  0x2b   :  { %s1296_s24 = scalar_lea.vmem %s42_s6, 1344  ;;  %p1301_p6 = scmp.lt.s32.totalorder %s42_s6, %s42_s6 }
  0x2c   :  { %p1297_p5 = scmp.ne.s32.totalorder %s42_s6, %s1296_s24  ;;  %p1302_p7 = scmp.lt.s32.totalorder %s1296_s24, %s1296_s24 }
  0x2e   :  { %p1303_p8 = por %p1302_p7, %p1301_p6 }
  0x30   :  { %p1304_p9 = pnand %p1303_p8, %p1297_p5 }
  0x32   :  { %1307 = shalt.err (!%p1304_p9)
}
  0x33   :  { %47 = dma.hbm_to_vmem [thread:$0]  %s1839_s3, 1344, %s42_s6, [#allocation6], %s1337_s25, %s1337_s25, %s1338_s26  }
  0x34   :  { %1330 = dma.done.wait [#allocation3], 16  }
  0x35   :  { %1331 = vsyncadd [#allocation3], 4294967280 }
  0x36   :  { %1332 = dma.done.wait [#allocation6], 2688  }
  0x37   :  { %1333 = vsyncadd [#allocation6], 4294964608  ;;  %v60_v0 = vlaneseq  ;;  %v1417_v7 = vld [vmem:[#allocation2] ss:$0 sm:$0xff]  ;;  %v1341_v10 = vmov 1.0|1.0  }
  0x38   :  { %v1422_v8 = vld [vmem:[%s1837_s1] ss:$0 sm:$0xff]  ;;  %v1861_v17 = vmov 0  ;;  %v1219_v18 = vld [vmem:[#allocation7 + $0x1c] sm:$0xff]   ;;  %v1863_v19 = vmov 0  ;;  %v1865_v22 = vmov 0 }
  0x39   :  { %v1410_v1 = vshrl.u32 %v60_v0, 7  ;;  %v1218_v14 = vld [vmem:[#allocation5 + $0x1c] sm:$0xff]   ;;  %1099 = vmatprep.mubr.bf16.mxu1 %v1219_v18  ;;  %v1867_v23 = vmov 0  ;;  %v1869_v26 = vmov 0  ;;  %v1871_v27 = vmov 0  ;;  %v1220_v38 = vld [vmem:[#allocation5 + $0x24] sm:$0xff]  }
  0x3a   :  { %1051 = vmatprep.mubr.bf16.mxu0 %v1218_v14  ;;  %v1221_v39 = vld [vmem:[#allocation7 + $0x24] sm:$0xff]   ;;  %v1222_v40 = vld [vmem:[#allocation5 + $0x2c] sm:$0xff]   ;;  %v1223_v41 = vld [vmem:[#allocation7 + $0x2c] sm:$0xff]   ;;  %s1342_s1 = smov [#allocation8]  }
  0x3b   :  { %v62_v2 = vadd.s32 8, %v1410_v1  ;;  %v63_v3 = vadd.s32 16, %v1410_v1  ;;  %v64_v4 = vadd.s32 24, %v1410_v1  ;;  %v65_v5 = vadd.s32 32, %v1410_v1  ;;  %v1224_v42 = vld [vmem:[#allocation5 + $0x34] ss:$0 sps:$4 sm:$0xff]  }
  0x3c   :  { %v66_v6 = vadd.s32 40, %v1410_v1  ;;  %vm81_vm0 = vcmp.eq.s32.totalorder %v1410_v1, %v1417_v7  ;;  %vm141_vm2 = vcmp.eq.s32.totalorder %v1410_v1, %v1422_v8  ;;  %v67_v12 = vadd.s32 48, %v1410_v1  ;;  %v1225_v43 = vld [vmem:[#allocation7 + $0x34] ss:$0 sps:$4 sm:$0xff]   ;;  %v1226_v44 = vld [vmem:[#allocation5] sm:$0xff]   ;;  %v1227_v45 = vld [vmem:[#allocation7] sm:$0xff]  }
  0x3d   :  { %vm82_vm1 = vcmp.eq.s32.totalorder %v62_v2, %v1417_v7  ;;  %vm142_vm3 = vcmp.eq.s32.totalorder %v62_v2, %v1422_v8  ;;  %vm83_vm5 = vcmp.eq.s32.totalorder %v63_v3, %v1417_v7  ;;  %vm84_vm6 = vcmp.eq.s32.totalorder %v64_v4, %v1417_v7  ;;  %v1228_v46 = vld [vmem:[#allocation5 + $0x8] sm:$0xff]   ;;  %v1229_v47 = vld [vmem:[#allocation7 + $0x8] sm:$0xff]   ;;  %v1230_v48 = vld [vmem:[#allocation5 + $0x10] sm:$0xff]   ;;  %s799_s26 = sshll.u32 %s1342_s1, 4  ;;  %s800_s26 = int_to_ptr.vmem [resolvable:$true] %s799_s26 }
  0x3e   :  { %vm1430_vm4 = vmpackc.low %vm82_vm1, %vm81_vm0  ;;  %vm143_vm7 = vcmp.eq.s32.totalorder %v63_v3, %v1422_v8  ;;  %vm144_vm8 = vcmp.eq.s32.totalorder %v64_v4, %v1422_v8  ;;  %vm85_vm10 = vcmp.eq.s32.totalorder %v65_v5, %v1417_v7  ;;  %vm86_vm11 = vcmp.eq.s32.totalorder %v66_v6, %v1417_v7  ;;  %v1231_v49 = vld [vmem:[#allocation7 + $0x10] sm:$0xff]   ;;  %v1232_v50 = vld [vmem:[#allocation5 + $0x18] ss:$0 sps:$4 sm:$0xff]   ;;  %s1308_s28 = scalar_lea.vmem %s800_s26, 16  ;;  %s1312_s29 = scalar_lea.vmem %s800_s26, 32 }
  0x3f   :  { %1035 = vmatprep.subr.msk.bf16.mxu0 %vm1430_vm4, %v1341_v10  ;;  %vm1441_vm9 = vmpackc.low %vm142_vm3, %vm141_vm2  ;;  %v68_v13 = vadd.s32 56, %v1410_v1  ;;  %vm145_vm13 = vcmp.eq.s32.totalorder %v65_v5, %v1422_v8  ;;  %vm146_vm14 = vcmp.eq.s32.totalorder %v66_v6, %v1422_v8  ;;  %vm87_vm2 = vcmp.eq.s32.totalorder %v67_v12, %v1417_v7  ;;  %v1233_v51 = vld [vmem:[#allocation7 + $0x18] ss:$0 sps:$4 sm:$0xff]   ;;  %v1234_v52 = vld [vmem:[#allocation5 + $0x38] sm:$0xff]   ;;  %p1309_p10 = scmp.ne.s32.totalorder %s800_s26, %s1308_s28  ;;  %p1313_p11 = scmp.lt.s32.totalorder %s800_s26, %s800_s26 }
  0x40   :  { %1083 = vmatprep.subr.msk.bf16.mxu1 %vm1441_vm9, %v1341_v10  ;;  %1036 = vmatpush3.bf16.msk.msra.mxu0 %vm1430_vm4, %v1341_v10  ;;  %vm1455_vm12 = vmpackc.low %vm84_vm6, %vm83_vm5  ;;  %v69_v20 = vadd.s32 64, %v1410_v1  ;;  %v70_v21 = vadd.s32 72, %v1410_v1  ;;  %vm147_vm5 = vcmp.eq.s32.totalorder %v67_v12, %v1422_v8  ;;  %v71_v24 = vadd.s32 80, %v1410_v1  ;;  %v1235_v53 = vld [vmem:[#allocation7 + $0x38] sm:$0xff]   ;;  %v1236_v54 = vld [vmem:[#allocation5 + $0x40] sm:$0xff]   ;;  %p1314_p12 = scmp.lt.s32.totalorder %s1312_s29, %s1308_s28 }
  0x41   :  { %1084 = vmatpush3.bf16.msk.msra.mxu1 %vm1441_vm9, %v1341_v10  ;;  %1037 = vmatprep.subr.msk.bf16.mxu0 %vm1455_vm12, %v1341_v10  ;;  %vm1471_vm15 = vmpackc.low %vm144_vm8, %vm143_vm7  ;;  %vm88_vm3 = vcmp.eq.s32.totalorder %v68_v13, %v1417_v7  ;;  %vm148_vm6 = vcmp.eq.s32.totalorder %v68_v13, %v1422_v8  ;;  %v72_v25 = vadd.s32 88, %v1410_v1  ;;  %v73_v28 = vadd.s32 96, %v1410_v1  ;;  %v1237_v55 = vld [vmem:[#allocation7 + $0x40] sm:$0xff]   ;;  %v1238_v56 = vld [vmem:[#allocation5 + $0x48] sm:$0xff]  }
  0x42   :  { %1085 = vmatprep.subr.msk.bf16.mxu1 %vm1471_vm15, %v1341_v10  ;;  %vm1478_vm0 = vmpackc.low %vm86_vm11, %vm85_vm10  ;;  %vm89_vm10 = vcmp.eq.s32.totalorder %v69_v20, %v1417_v7  ;;  %vm90_vm11 = vcmp.eq.s32.totalorder %v70_v21, %v1417_v7  ;;  %v74_v29 = vadd.s32 104, %v1410_v1  ;;  %v75_v32 = vadd.s32 112, %v1410_v1  ;;  %v1239_v57 = vld [vmem:[#allocation7 + $0x48] sm:$0xff]   ;;  %v1240_v58 = vld [vmem:[#allocation5 + $0x50] ss:$0 sps:$4 sm:$0xff]   ;;  %p1315_p13 = por %p1314_p12, %p1313_p11 }
  0x43   :  { %v1862_v17 = vsel %vm1478_vm0, 4294967295, %v1861_v17  ;;  %vm1482_vm1 = vmpackc.low %vm146_vm14, %vm145_vm13  ;;  %vm149_vm13 = vcmp.eq.s32.totalorder %v69_v20, %v1422_v8  ;;  %vm150_vm14 = vcmp.eq.s32.totalorder %v70_v21, %v1422_v8  ;;  %v76_v33 = vadd.s32 120, %v1410_v1  ;;  %v1241_v59 = vld [vmem:[#allocation7 + $0x50] ss:$0 sps:$4 sm:$0xff]  }
  0x44   :  { %v1864_v19 = vsel %vm1482_vm1, 4294967295, %v1863_v19  ;;  %1038 = vmatpush3.bf16.msk.msra.mxu0 %vm1455_vm12, %v1341_v10  ;;  %vm1504_vm7 = vmpackc.low %vm88_vm3, %vm87_vm2  ;;  %p1316_p0 = pnand %p1315_p13, %p1309_p10 }
  0x45   :  { %1086 = vmatpush3.bf16.msk.msra.mxu1 %vm1471_vm15, %v1341_v10  ;;  %1039 = vmatprep.subr.msk.bf16.mxu0 %vm1478_vm0, %v1341_v10  ;;  %v1866_v22 = vsel %vm1504_vm7, 4294967295, %v1865_v22  ;;  %vm1508_vm8 = vmpackc.low %vm148_vm6, %vm147_vm5  ;;  %vm91_vm5 = vcmp.eq.s32.totalorder %v71_v24, %v1417_v7  ;;  %vm92_vm6 = vcmp.eq.s32.totalorder %v72_v25, %v1417_v7 }
  0x46   :  { %1087 = vmatprep.subr.msk.bf16.mxu1 %vm1482_vm1, %v1341_v10  ;;  %v1868_v23 = vsel %vm1508_vm8, 4294967295, %v1867_v23  ;;  %vm1530_vm2 = vmpackc.low %vm90_vm11, %vm89_vm10  ;;  %vm151_vm10 = vcmp.eq.s32.totalorder %v71_v24, %v1422_v8  ;;  %vm152_vm11 = vcmp.eq.s32.totalorder %v72_v25, %v1422_v8 }
  0x47   :  { %v1870_v26 = vsel %vm1530_vm2, 4294967295, %v1869_v26  ;;  %vm1534_vm3 = vmpackc.low %vm150_vm14, %vm149_vm13 }
  0x48   :  { %1040 = vmatpush3.bf16.msk.msra.mxu0 %vm1478_vm0, %v1341_v10  ;;  %v1872_v27 = vsel %vm1534_vm3, 4294967295, %v1871_v27  ;;  %vm1556_vm13 = vmpackc.low %vm92_vm6, %vm91_vm5  ;;  %vm153_vm5 = vcmp.eq.s32.totalorder %v73_v28, %v1422_v8  ;;  %vm154_vm6 = vcmp.eq.s32.totalorder %v74_v29, %v1422_v8  ;;  %vm156_vm0 = vcmp.eq.s32.totalorder %v76_v33, %v1422_v8 }
  0x49   :  { %1088 = vmatpush3.bf16.msk.msra.mxu1 %vm1482_vm1, %v1341_v10  ;;  %1041 = vmatprep.subr.msk.bf16.mxu0 %vm1504_vm7, %v1341_v10  ;;  %vm1560_vm14 = vmpackc.low %vm152_vm11, %vm151_vm10  ;;  %vm155_vm1 = vcmp.eq.s32.totalorder %v75_v32, %v1422_v8 }
  0x4a   :  { %1089 = vmatprep.subr.msk.bf16.mxu1 %vm1508_vm8, %v1341_v10  ;;  %vm1586_vm11 = vmpackc.low %vm154_vm6, %vm153_vm5  ;;  %vm1889_vm5 = vnez %v1870_v26  ;;  %vm1890_vm6 = vnez %v1872_v27 }
  0x4c   :  { %1042 = vmatpush3.bf16.msk.msra.mxu0 %vm1504_vm7, %v1341_v10  ;;  %vm93_vm7 = vcmp.eq.s32.totalorder %v73_v28, %v1417_v7 }
  0x4d   :  { %1090 = vmatpush3.bf16.msk.msra.mxu1 %vm1508_vm8, %v1341_v10  ;;  %1043 = vmatprep.subr.msk.bf16.mxu0 %vm1530_vm2, %v1341_v10  ;;  %vm94_vm8 = vcmp.eq.s32.totalorder %v74_v29, %v1417_v7 }
  0x4e   :  { %1091 = vmatprep.subr.msk.bf16.mxu1 %vm1534_vm3, %v1341_v10  ;;  %vm1582_vm10 = vmpackc.low %vm94_vm8, %vm93_vm7 }
  0x4f   :  { %vm1610_vm8 = vmpackc.low %vm156_vm0, %vm155_vm1  ;;  %vm1885_vm0 = vnez %v1862_v17  ;;  %vm1886_vm1 = vnez %v1864_v19 }
  0x50   :  { %1044 = vmatpush3.bf16.msk.msra.mxu0 %vm1530_vm2, %v1341_v10  ;;  %vm95_vm2 = vcmp.eq.s32.totalorder %v75_v32, %v1417_v7 }
  0x51   :  { %1092 = vmatpush3.bf16.msk.msra.mxu1 %vm1534_vm3, %v1341_v10  ;;  %1045 = vmatprep.subr.msk.bf16.mxu0 %vm1556_vm13, %v1341_v10  ;;  %vm96_vm3 = vcmp.eq.s32.totalorder %v76_v33, %v1417_v7 }
  0x52   :  { %1093 = vmatprep.subr.msk.bf16.mxu1 %vm1560_vm14, %v1341_v10  ;;  %vm1606_vm7 = vmpackc.low %vm96_vm3, %vm95_vm2  ;;  %vm1887_vm2 = vnez %v1866_v22  ;;  %vm1888_vm3 = vnez %v1868_v23 }
  0x54   :  { %1046 = vmatpush3.bf16.msk.msra.mxu0 %vm1556_vm13, %v1341_v10 }
  0x55   :  { %1094 = vmatpush3.bf16.msk.msra.mxu1 %vm1560_vm14, %v1341_v10  ;;  %1047 = vmatprep.subr.msk.bf16.mxu0 %vm1582_vm10, %v1341_v10 }
  0x56   :  { %1095 = vmatprep.subr.msk.bf16.mxu1 %vm1586_vm11, %v1341_v10 }
  0x58   :  { %1048 = vmatpush3.bf16.msk.msra.mxu0 %vm1582_vm10, %v1341_v10 }
  0x59   :  { %1096 = vmatpush3.bf16.msk.msra.mxu1 %vm1586_vm11, %v1341_v10  ;;  %1049 = vmatprep.subr.msk.bf16.mxu0 %vm1606_vm7, %v1341_v10 }
  0x5a   :  { %1097 = vmatprep.subr.msk.bf16.mxu1 %vm1610_vm8, %v1341_v10 }
  0x5c   :  { %1050 = vmatpush3.bf16.msk.msra.mxu0 %vm1606_vm7, %v1341_v10 }
  0x5d   :  { %1098 = vmatpush3.bf16.msk.msra.mxu1 %vm1610_vm8, %v1341_v10  ;;  %1059 = vmatprep.subr.msk.bf16.mxu0 %vm1430_vm4, %v1341_v10 }
  0x5e   :  { %1107 = vmatprep.subr.msk.bf16.mxu1 %vm1441_vm9, %v1341_v10 }
  0x5f   :  { %1052 = vmatmul.mubr.bf16.vlgmr.msra.gmra.mrb[0].mxu0 %v1220_v38 }
  0x60   :  { %1060 = vmatpush3.bf16.msk.msra.mxu0 %vm1430_vm4, %v1341_v10  ;;  %1100 = vmatmul.mubr.bf16.vlgmr.msra.gmra.mrb[0].mxu1 %v1221_v39 }
  0x61   :  { %1108 = vmatpush3.bf16.msk.msra.mxu1 %vm1441_vm9, %v1341_v10  ;;  %1061 = vmatprep.subr.msk.bf16.mxu0 %vm1455_vm12, %v1341_v10 }
  0x62   :  { %1109 = vmatprep.subr.msk.bf16.mxu1 %vm1471_vm15, %v1341_v10  ;;  %1055 = vmatprep.mubr.bf16.mxu0 %v1222_v40 }
  0x63   :  { %1103 = vmatprep.mubr.bf16.mxu1 %v1223_v41 }
  0x64   :  { %1062 = vmatpush3.bf16.msk.msra.mxu0 %vm1455_vm12, %v1341_v10 }
  0x65   :  { %1110 = vmatpush3.bf16.msk.msra.mxu1 %vm1471_vm15, %v1341_v10  ;;  %1063 = vmatprep.subr.msk.bf16.mxu0 %vm1885_vm0, %v1341_v10 }
  0x66   :  { %1111 = vmatprep.subr.msk.bf16.mxu1 %vm1886_vm1, %v1341_v10 }
  0x67   :  { %1056 = vmatmul.mubr.bf16.gmra.mrb[4].mxu0 %v1224_v42 }
  0x68   :  { %1064 = vmatpush3.bf16.msk.msra.mxu0 %vm1885_vm0, %v1341_v10  ;;  %1104 = vmatmul.mubr.bf16.gmra.mrb[4].mxu1 %v1225_v43 }
  0x69   :  { %1112 = vmatpush3.bf16.msk.msra.mxu1 %vm1886_vm1, %v1341_v10  ;;  %1065 = vmatprep.subr.msk.bf16.mxu0 %vm1887_vm2, %v1341_v10 }
  0x6a   :  { %1113 = vmatprep.subr.msk.bf16.mxu1 %vm1888_vm3, %v1341_v10  ;;  %1075 = vmatprep.mubr.bf16.mxu0 %v1226_v44 }
  0x6b   :  { %1123 = vmatprep.mubr.bf16.mxu1 %v1227_v45 }
  0x6c   :  { %1066 = vmatpush3.bf16.msk.msra.mxu0 %vm1887_vm2, %v1341_v10 }
  0x6d   :  { %1114 = vmatpush3.bf16.msk.msra.mxu1 %vm1888_vm3, %v1341_v10  ;;  %1067 = vmatprep.subr.msk.bf16.mxu0 %vm1889_vm5, %v1341_v10 }
  0x6e   :  { %1115 = vmatprep.subr.msk.bf16.mxu1 %vm1890_vm6, %v1341_v10 }
  0x70   :  { %1068 = vmatpush3.bf16.msk.msra.mxu0 %vm1889_vm5, %v1341_v10 }
  0x71   :  { %1116 = vmatpush3.bf16.msk.msra.mxu1 %vm1890_vm6, %v1341_v10  ;;  %1069 = vmatprep.subr.msk.bf16.mxu0 %vm1556_vm13, %v1341_v10 }
  0x72   :  { %1117 = vmatprep.subr.msk.bf16.mxu1 %vm1560_vm14, %v1341_v10 }
  0x74   :  { %1070 = vmatpush3.bf16.msk.msra.mxu0 %vm1556_vm13, %v1341_v10 }
  0x75   :  { %1118 = vmatpush3.bf16.msk.msra.mxu1 %vm1560_vm14, %v1341_v10  ;;  %1071 = vmatprep.subr.msk.bf16.mxu0 %vm1582_vm10, %v1341_v10 }
  0x76   :  { %1119 = vmatprep.subr.msk.bf16.mxu1 %vm1586_vm11, %v1341_v10 }
  0x78   :  { %1072 = vmatpush3.bf16.msk.msra.mxu0 %vm1582_vm10, %v1341_v10 }
  0x79   :  { %1120 = vmatpush3.bf16.msk.msra.mxu1 %vm1586_vm11, %v1341_v10  ;;  %1073 = vmatprep.subr.msk.bf16.mxu0 %vm1606_vm7, %v1341_v10 }
  0x7a   :  { %1121 = vmatprep.subr.msk.bf16.mxu1 %vm1610_vm8, %v1341_v10 }
  0x7c   :  { %1074 = vmatpush3.bf16.msk.msra.mxu0 %vm1606_vm7, %v1341_v10 }
  0x7d   :  { %1122 = vmatpush3.bf16.msk.msra.mxu1 %vm1610_vm8, %v1341_v10  ;;  %1131 = vmatprep.subr.msk.bf16.mxu0 %vm1430_vm4, %v1341_v10 }
  0x7e   :  { %1155 = vmatprep.subr.msk.bf16.mxu1 %vm1441_vm9, %v1341_v10 }
  0x7f   :  { %1076 = vmatmul.mubr.bf16.vlgmr.msra.gmra.mrb[0].mxu0 %v1228_v46 }
  0x80   :  { %1124 = vmatmul.mubr.bf16.vlgmr.msra.gmra.mrb[0].mxu1 %v1229_v47  ;;  %1132 = vmatpush3.bf16.msk.msra.mxu0 %vm1430_vm4, %v1341_v10 }
  0x81   :  { %1156 = vmatpush3.bf16.msk.msra.mxu1 %vm1441_vm9, %v1341_v10  ;;  %1133 = vmatprep.subr.msk.bf16.mxu0 %vm1455_vm12, %v1341_v10 }
  0x82   :  { %1157 = vmatprep.subr.msk.bf16.mxu1 %vm1471_vm15, %v1341_v10  ;;  %1079 = vmatprep.mubr.bf16.mxu0 %v1230_v48 }
  0x83   :  { %1127 = vmatprep.mubr.bf16.mxu1 %v1231_v49 }
  0x84   :  { %1134 = vmatpush3.bf16.msk.msra.mxu0 %vm1455_vm12, %v1341_v10 }
  0x85   :  { %1158 = vmatpush3.bf16.msk.msra.mxu1 %vm1471_vm15, %v1341_v10  ;;  %1135 = vmatprep.subr.msk.bf16.mxu0 %vm1885_vm0, %v1341_v10 }
  0x86   :  { %1159 = vmatprep.subr.msk.bf16.mxu1 %vm1886_vm1, %v1341_v10 }
  0x87   :  { %1080 = vmatmul.mubr.bf16.gmra.mrb[4].mxu0 %v1232_v50 }
  0x88   :  { %1136 = vmatpush3.bf16.msk.msra.mxu0 %vm1885_vm0, %v1341_v10  ;;  %1128 = vmatmul.mubr.bf16.gmra.mrb[4].mxu1 %v1233_v51 }
  0x89   :  { %1160 = vmatpush3.bf16.msk.msra.mxu1 %vm1886_vm1, %v1341_v10  ;;  %1137 = vmatprep.subr.msk.bf16.mxu0 %vm1887_vm2, %v1341_v10 }
  0x8a   :  { %1161 = vmatprep.subr.msk.bf16.mxu1 %vm1888_vm3, %v1341_v10  ;;  %1147 = vmatprep.mubr.bf16.mxu0 %v1234_v52 }
  0x8b   :  { %1171 = vmatprep.mubr.bf16.mxu1 %v1235_v53 }
  0x8c   :  { %1138 = vmatpush3.bf16.msk.msra.mxu0 %vm1887_vm2, %v1341_v10 }
  0x8d   :  { %1162 = vmatpush3.bf16.msk.msra.mxu1 %vm1888_vm3, %v1341_v10  ;;  %1139 = vmatprep.subr.msk.bf16.mxu0 %vm1889_vm5, %v1341_v10 }
  0x8e   :  { %1163 = vmatprep.subr.msk.bf16.mxu1 %vm1890_vm6, %v1341_v10 }
  0x90   :  { %1140 = vmatpush3.bf16.msk.msra.mxu0 %vm1889_vm5, %v1341_v10 }
  0x91   :  { %1164 = vmatpush3.bf16.msk.msra.mxu1 %vm1890_vm6, %v1341_v10  ;;  %1141 = vmatprep.subr.msk.bf16.mxu0 %vm1556_vm13, %v1341_v10 }
  0x92   :  { %1165 = vmatprep.subr.msk.bf16.mxu1 %vm1560_vm14, %v1341_v10 }
  0x94   :  { %1142 = vmatpush3.bf16.msk.msra.mxu0 %vm1556_vm13, %v1341_v10 }
  0x95   :  { %1166 = vmatpush3.bf16.msk.msra.mxu1 %vm1560_vm14, %v1341_v10  ;;  %1143 = vmatprep.subr.msk.bf16.mxu0 %vm1582_vm10, %v1341_v10 }
  0x96   :  { %1167 = vmatprep.subr.msk.bf16.mxu1 %vm1586_vm11, %v1341_v10 }
  0x98   :  { %1144 = vmatpush3.bf16.msk.msra.mxu0 %vm1582_vm10, %v1341_v10 }
  0x99   :  { %1168 = vmatpush3.bf16.msk.msra.mxu1 %vm1586_vm11, %v1341_v10  ;;  %1145 = vmatprep.subr.msk.bf16.mxu0 %vm1606_vm7, %v1341_v10 }
  0x9a   :  { %1169 = vmatprep.subr.msk.bf16.mxu1 %vm1610_vm8, %v1341_v10 }
  0x9c   :  { %1146 = vmatpush3.bf16.msk.msra.mxu0 %vm1606_vm7, %v1341_v10 }
  0x9d   :  { %1170 = vmatpush3.bf16.msk.msra.mxu1 %vm1610_vm8, %v1341_v10 }
  0x9f   :  { %1148 = vmatmul.mubr.bf16.vlgmr.msra.gmra.mrb[0].mxu0 %v1236_v54 }
  0xa0   :  { %1172 = vmatmul.mubr.bf16.vlgmr.msra.gmra.mrb[0].mxu1 %v1237_v55  ;;  %1151 = vmatprep.mubr.bf16.mxu0 %v1238_v56 }
  0xa1   :  { %1175 = vmatprep.mubr.bf16.mxu1 %v1239_v57 }
  0xa7   :  { %1152 = vmatmul.mubr.bf16.gmra.mrb[4].mxu0 %v1240_v58 }
  0xa8   :  { %1176 = vmatmul.mubr.bf16.gmra.mrb[4].mxu1 %v1241_v59 }
 0x172   :  { %v1149_v60 = vpop.f32.mrb[0].mxu0 }
 0x173   :  { %v1173_v61 = vpop.f32.mrb[0].mxu1  ;;  %v635_v62 = vpop.f32.mrb[1].mxu0 }
 0x174   :  { %v775_v63 = vmul.f32 %v1173_v61, %v1149_v60  ;;  %v736_v0 = vpop.f32.mrb[1].mxu1  ;;  %v1150_v1 = vpop.f32.mrb[2].mxu0 }
 0x175   :  { %v773_v2 = vmul.f32 %v736_v0, %v635_v62  ;;  %v1174_v3 = vpop.f32.mrb[2].mxu1  ;;  %v638_v4 = vpop.f32.mrb[3].mxu0 }
 0x176   :  { %v776_v5 = vmul.f32 %v1174_v3, %v1150_v1  ;;  %v739_v6 = vpop.f32.mrb[3].mxu1 }
 0x177   :  { %v774_v7 = vmul.f32 %v739_v6, %v638_v4 }
 0x179   :  { %v780_v8 = vadd.f32 %v774_v7, %v773_v2 }
 0x17a   :  { %v1153_v9 = vpop.f32.mrb[4].mxu0 }
 0x17b   :  { %v781_v10 = vadd.f32 %v780_v8, %v775_v63  ;;  %v1177_v11 = vpop.f32.mrb[4].mxu1  ;;  %v651_v12 = vpop.f32.mrb[5].mxu0 }
 0x17c   :  { %v779_v13 = vmul.f32 %v1177_v11, %v1153_v9  ;;  %v752_v14 = vpop.f32.mrb[5].mxu1  ;;  %v1154_v15 = vpop.f32.mrb[6].mxu0 }
 0x17d   :  { %v777_v16 = vmul.f32 %v752_v14, %v651_v12  ;;  %v782_v17 = vadd.f32 %v781_v10, %v776_v5  ;;  %v1178_v18 = vpop.f32.mrb[6].mxu1  ;;  %v654_v19 = vpop.f32.mrb[7].mxu0 }
 0x17e   :  { %v755_v20 = vpop.f32.mrb[7].mxu1 }
 0x17f   :  { %v783_v21 = vadd.f32 %v782_v17, %v777_v16  ;;  %v778_v22 = vmul.f32 %v755_v20, %v654_v19 }
 0x181   :  { %v784_v23 = vadd.f32 %v783_v21, %v778_v22 }
 0x183   :  { %v785_v24 = vadd.f32 %v784_v23, %v779_v13 }
 0x185   :  { %v786_v25 = vrot.slane %v785_v24, 4 }
 0x187   :  { %v787_v26 = vadd.f32 %v786_v25, %v785_v24 }
 0x189   :  { %v788_v27 = vrot.slane %v787_v26, 2 }
 0x18b   :  { %v789_v28 = vadd.f32 %v788_v27, %v787_v26 }
 0x18d   :  { %v790_v29 = vrot.slane %v789_v28, 1 }
 0x18f   :  { %v791_v30 = vadd.f32 %v790_v29, %v789_v28 }
 0x191   :  { %792 = vst [vmem:[#allocation8] sm:$0x1] %v791_v30 }
 0x192   :  { %1319 = shalt.err (!%p1316_p0)
}
 0x193   :  { %s1320_s6 = scalar_lea.hbm %s1840_s4, 16 }
 0x194   :  { %p1321_p1 = scmp.ne.s32.totalorder %s1840_s4, %s1320_s6  ;;  %p1324_p2 = scmp.lt.u32.totalorder %s1320_s6, %s1840_s4 }
 0x196   :  { %p1326_p3 = pnand %p1324_p2, %p1321_p1 }
 0x198   :  { %1329 = shalt.err (!%p1326_p3)
}
 0x199   :  { %802 = dma.vmem_to_hbm [thread:$0]  %s800_s26, 16, %s1840_s4, [#allocation4]  }
 0x19a   :  { %1334 = dma.done.wait [#allocation4], 16  }
 0x19b   :  { %1335 = vsyncadd [#allocation4], 4294967280 }
 0x19c   :  { %806 = vsyncpa [#allocation3], 1 }
 0x19d   :  { %807 = vsyncpa [#allocation6], 1 }
 0x19e   :  { %808 = vsyncpa [#allocation4], 1 }

</bundles_post_ra>
